<compile_context>
chip_gen: v5e
topology: v5e:2x2
jax: 0.10.0
libtpu: 0.0.40
codegen_flags: <defaults>
</compile_context>

<pallas_src>
import functools

import jax
import jax.numpy as jnp
from jax.experimental import pallas as pl
from jax.experimental.pallas import tpu as pltpu

BN_EPS = 1e-5


def _round_up(x, m):
    return ((x + m - 1) // m) * m


def _pad2(a, rows, cols):
    """Zero-pad a 2D array up to (rows, cols)."""
    return jnp.pad(a, ((0, rows - a.shape[0]), (0, cols - a.shape[1])))


def pc_encoder_kernel(x_ref,
                      w1_ref, b1_ref, w2_ref, b2_ref, w3_ref, b3_ref,
                      w4_ref, b4_ref, w5_ref, b5_ref,
                      out_ref):
    t = pl.program_id(2)   # point-tile (reduction) axis, innermost

    def layer(h_bf16, w_ref, b_ref):
        y = jnp.dot(h_bf16, w_ref[...],
                    preferred_element_type=jnp.float32) + b_ref[...]
        return jnp.maximum(y, 0.0)                       # f32 epilogue

    x = x_ref[...]                                       # (TN, 8) bf16
    h = layer(x, w1_ref, b1_ref)                         # (TN, 128) f32
    h = layer(h.astype(jnp.bfloat16), w2_ref, b2_ref)    # (TN, 128)
    h = layer(h.astype(jnp.bfloat16), w3_ref, b3_ref)    # (TN, 128)
    h = layer(h.astype(jnp.bfloat16), w4_ref, b4_ref)    # (TN, 256)
    # TODO(synk): Dropout2d is identity in eval mode; training-mode dropout
    # (and batch-statistics BN) is not implemented here.
    h = layer(h.astype(jnp.bfloat16), w5_ref, b5_ref)    # (TN, bottleneck)

    # (8, bottleneck) partial max: reduce only over the leading grouped-sublane
    # axis (pure vreg-wise VPU maxes, no XLU cross-sublane reduce), then do an
    # unmasked full-(8,128) accumulate into the resident output block.
    tn, nb = h.shape
    partial = jnp.max(h.reshape(tn // 8, 8, nb), axis=0)

    @pl.when(t == 0)
    def _():
        out_ref[...] = partial

    @pl.when(t > 0)
    def _():
        out_ref[...] = jnp.maximum(out_ref[...], partial)


def fold_bn(params):
    """Fold BatchNorm2d (running stats) into each conv's weight/bias."""
    folded = {}
    for i in range(1, 6):
        w = params[f"conv{i}_w"]                 # (in, out)
        b = params[f"conv{i}_b"]                 # (out,)
        s = params[f"bn{i}_gamma"] / jnp.sqrt(params[f"bn{i}_var"] + BN_EPS)
        folded[f"w{i}"] = w * s[None, :]
        folded[f"b{i}"] = ((b - params[f"bn{i}_mean"]) * s
                           + params[f"bn{i}_beta"])[None, :]
    return folded


@functools.partial(jax.jit, static_argnames=("tile_n", "point_splits"))
def pc_encoder(points, params, *, tile_n=1024, point_splits=None):
    """points: (B, N, 6) float32.  Returns (B, bottleneck) float32."""
    B, N, C = points.shape
    folded = fold_bn(params)
    bottleneck = folded["w5"].shape[1]

    # --- tile / grid geometry -------------------------------------------
    # Force the point tile to a multiple of 256 (>= 256): keeps BlockSpec
    # divisibility, bf16 sublane packing, and amortizes per-step overhead.
    tn = _round_up(max(1, min(tile_n, N)), 256)
    # Split the point reduction into `splits` parallel halves when batch is
    # too small to occupy both v7x TensorCores (no-op on 1-TC v5e/v6e).
    splits_req = point_splits if point_splits is not None else (2 if B == 1 else 1)
    base_tiles = _round_up(N, tn) // tn
    splits = max(1, min(splits_req, base_tiles))
    n_pad = _round_up(N, splits * tn)
    tiles_per_split = n_pad // (splits * tn)

    # --- activations -----------------------------------------------------
    # Edge-replication point padding (max-invariant) + zero channel pad 6->8.
    # NOTE: for very large point clouds these wrapper passes could be moved
    # into the kernel (ragged last tile + in-kernel bf16 cast); negligible here.
    c_pad = _round_up(C, 8)
    x = points
    if n_pad != N:
        x = jnp.pad(x, ((0, 0), (0, n_pad - N), (0, 0)), mode="edge")
    if c_pad != C:
        x = jnp.pad(x, ((0, 0), (0, 0), (0, c_pad - C)))
    x = x.astype(jnp.bfloat16)

    # --- weights (BN-folded, zero-padded to lane/sublane-dense shapes) ----
    # Zero pads are exact no-ops: padded hidden channels get bias 0 -> ReLU 0,
    # and the matching zero rows of the next weight contribute nothing.
    weights = [
        (_pad2(folded["w1"], c_pad, 128), _pad2(folded["b1"], 1, 128)),
        (_pad2(folded["w2"], 128, 128), folded["b2"]),
        (folded["w3"], folded["b3"]),
        (folded["w4"], folded["b4"]),
        (folded["w5"], folded["b5"]),
    ]

    tps = tiles_per_split
    in_specs = [pl.BlockSpec((None, tn, c_pad),
                             lambda b, s, t: (b, s * tps + t, 0))]
    args = [x]
    for w, bias in weights:
        wv = w.astype(jnp.bfloat16)
        bv = bias.astype(jnp.float32)
        # Constant index_map -> weights/biases stay resident in VMEM.
        in_specs.append(pl.BlockSpec(wv.shape, lambda b, s, t: (0, 0)))
        in_specs.append(pl.BlockSpec(bv.shape, lambda b, s, t: (0, 0)))
        args += [wv, bv]

    # Output carried as (B, splits, 8, bottleneck): full-sublane unmasked
    # stores, resident across the reduction axis (constant in t).
    out_spec = pl.BlockSpec((None, None, 8, bottleneck),
                            lambda b, s, t: (b, s, 0, 0))
    out_shape = jax.ShapeDtypeStruct((B, splits, 8, bottleneck), jnp.float32)

    dims = [(c_pad, 128), (128, 128), (128, 128), (128, 256), (256, bottleneck)]
    flops = 2 * B * n_pad * sum(ci * co for ci, co in dims)
    bytes_accessed = int(
        x.size * 2
        + sum(int(a.size) * a.dtype.itemsize for a in args[1:])
        + B * splits * 8 * bottleneck * 4
    )

    out = pl.pallas_call(
        pc_encoder_kernel,
        out_shape=out_shape,
        grid=(B, splits, tiles_per_split),
        in_specs=in_specs,
        out_specs=out_spec,
        compiler_params=pltpu.CompilerParams(
            dimension_semantics=("parallel", "parallel", "arbitrary"),
            vmem_limit_bytes=32 * 1024 * 1024,
        ),
        cost_estimate=pl.CostEstimate(
            flops=flops, transcendentals=0, bytes_accessed=bytes_accessed),
    )(*args)
    # Tiny epilogue: reduce the 8 sublane partials and the split halves.
    return jnp.max(out, axis=(1, 2))


def init_params(key, bottleneck=128):
    """Deterministic PyTorch-style init for conv weights (stored (in,out))
    plus BatchNorm gamma/beta/running_mean/running_var."""
    dims = [(6, 64), (64, 128), (128, 128), (128, 256), (256, bottleneck)]
    params = {}
    keys = iter(jax.random.split(key, len(dims) * 6))
    for i, (cin, cout) in enumerate(dims, start=1):
        lim = 1.0 / (cin ** 0.5)
        params[f"conv{i}_w"] = jax.random.uniform(
            next(keys), (cin, cout), jnp.float32, -lim, lim)
        params[f"conv{i}_b"] = jax.random.uniform(
            next(keys), (cout,), jnp.float32, -lim, lim)
        params[f"bn{i}_gamma"] = jax.random.uniform(
            next(keys), (cout,), jnp.float32, 0.8, 1.2)
        params[f"bn{i}_beta"] = jax.random.uniform(
            next(keys), (cout,), jnp.float32, -0.1, 0.1)
        params[f"bn{i}_mean"] = 0.1 * jax.random.normal(
            next(keys), (cout,), jnp.float32)
        params[f"bn{i}_var"] = jax.random.uniform(
            next(keys), (cout,), jnp.float32, 0.8, 1.2)
    return params


def reference_f32(points, params):
    """Pure-JAX f32 reference of the PyTorch forward (eval mode)."""
    h = points
    for i in range(1, 6):
        y = jnp.dot(h, params[f"conv{i}_w"]) + params[f"conv{i}_b"]
        s = params[f"bn{i}_gamma"] / jnp.sqrt(params[f"bn{i}_var"] + BN_EPS)
        y = (y - params[f"bn{i}_mean"]) * s + params[f"bn{i}_beta"]
        h = jnp.maximum(y, 0.0)
    return jnp.max(h, axis=1)                            # (B, bottleneck)


def reference_bf16(points, params):
    """Pure-JAX reference with the kernel's dtype policy (bf16 matmul
    operands, f32 accumulation / epilogue) for a tight comparison."""
    folded = fold_bn(params)
    h = points.astype(jnp.bfloat16)
    act = None
    for i in range(1, 6):
        w = folded[f"w{i}"].astype(jnp.bfloat16)
        y = jnp.dot(h, w, preferred_element_type=jnp.float32) + folded[f"b{i}"]
        act = jnp.maximum(y, 0.0)
        h = act.astype(jnp.bfloat16)
    return jnp.max(act, axis=1)


def _check(out, pts, params):
    ref_b = reference_bf16(pts, params)
    ref_f = reference_f32(pts, params)
    err_b = float(jnp.max(jnp.abs(out - ref_b)))
    err_f = float(jnp.max(jnp.abs(out - ref_f)))
    assert jnp.allclose(out, ref_b, atol=1e-4, rtol=1e-4), err_b
    assert jnp.allclose(out, ref_f, atol=7e-2, rtol=7e-2), err_f


if __name__ == "__main__":
    bottleneck = 128
    key = jax.random.PRNGKey(0)
    kx1, kx2, kp = jax.random.split(key, 3)
    params = init_params(kp, bottleneck=bottleneck)

    # Case 1: B=2, N=600 -> 256-point tiles, ragged last tile (edge pad),
    # multi-tile max accumulation across the "arbitrary" grid axis.
    pts1 = jax.random.normal(kx1, (2, 600, 6), jnp.float32)
    out1 = pc_encoder(pts1, params, tile_n=256)
    jax.block_until_ready(out1)
    assert out1.shape == (2, bottleneck)
    _check(out1, pts1, params)

    # Case 2: B=1, N=2048 -> default 1024-point tiles; the point range is
    # split into 2 "parallel" halves (uses both TensorCores on v7x).
    pts2 = jax.random.normal(kx2, (1, 2048, 6), jnp.float32)
    out2 = pc_encoder(pts2, params)
    jax.block_until_ready(out2)
    assert out2.shape == (1, bottleneck)
    _check(out2, pts2, params)

    print("KERNEL_OK")
</pallas_src>

<mosaic_0001>
module attributes {stable_mosaic.version = 11 : i64} {
  func.func @pc_encoder_kernel(%arg0: i32, %arg1: i32, %arg2: i32, %arg3: memref<1x256x8xbf16, #tpu.memory_space<vmem>>, %arg4: memref<8x128xbf16, #tpu.memory_space<vmem>>, %arg5: memref<1x128xf32, #tpu.memory_space<vmem>>, %arg6: memref<128x128xbf16, #tpu.memory_space<vmem>>, %arg7: memref<1x128xf32, #tpu.memory_space<vmem>>, %arg8: memref<128x128xbf16, #tpu.memory_space<vmem>>, %arg9: memref<1x128xf32, #tpu.memory_space<vmem>>, %arg10: memref<128x256xbf16, #tpu.memory_space<vmem>>, %arg11: memref<1x256xf32, #tpu.memory_space<vmem>>, %arg12: memref<256x128xbf16, #tpu.memory_space<vmem>>, %arg13: memref<1x128xf32, #tpu.memory_space<vmem>>, %arg14: memref<1x1x8x128xf32, #tpu.memory_space<vmem>>) attributes {dimension_semantics = [#tpu.dimension_semantics<parallel>, #tpu.dimension_semantics<parallel>, #tpu.dimension_semantics<arbitrary>], iteration_bounds = array<i64: 2, 1, 3>, scalar_prefetch = 0 : i64, scratch_operands = 0 : i64, tpu.core_type = #tpu.core_type<tc>, window_params = [{transform_indices = @transform_0, window_bounds = array<i64: 1, 256, 8>}, {pipeline_mode = #tpu.pipeline_mode<synchronous>, transform_indices = @transform_1, window_bounds = array<i64: 8, 128>}, {pipeline_mode = #tpu.pipeline_mode<synchronous>, transform_indices = @transform_2, window_bounds = array<i64: 1, 128>}, {pipeline_mode = #tpu.pipeline_mode<synchronous>, transform_indices = @transform_3, window_bounds = array<i64: 128, 128>}, {pipeline_mode = #tpu.pipeline_mode<synchronous>, transform_indices = @transform_4, window_bounds = array<i64: 1, 128>}, {pipeline_mode = #tpu.pipeline_mode<synchronous>, transform_indices = @transform_5, window_bounds = array<i64: 128, 128>}, {pipeline_mode = #tpu.pipeline_mode<synchronous>, transform_indices = @transform_6, window_bounds = array<i64: 1, 128>}, {pipeline_mode = #tpu.pipeline_mode<synchronous>, transform_indices = @transform_7, window_bounds = array<i64: 128, 256>}, {pipeline_mode = #tpu.pipeline_mode<synchronous>, transform_indices = @transform_8, window_bounds = array<i64: 1, 256>}, {pipeline_mode = #tpu.pipeline_mode<synchronous>, transform_indices = @transform_9, window_bounds = array<i64: 256, 128>}, {pipeline_mode = #tpu.pipeline_mode<synchronous>, transform_indices = @transform_10, window_bounds = array<i64: 1, 128>}, {transform_indices = @transform_11, window_bounds = array<i64: 1, 1, 8, 128>}]} {
    %c0 = arith.constant 0 : index
    %c0_0 = arith.constant 0 : index
    %c0_1 = arith.constant 0 : index
    %0 = vector.load %arg3[%c0, %c0_0, %c0_1] : memref<1x256x8xbf16, #tpu.memory_space<vmem>>, vector<1x256x8xbf16>
    %1 = vector.shape_cast %0 : vector<1x256x8xbf16> to vector<256x8xbf16>
    %c0_2 = arith.constant 0 : index
    %c0_3 = arith.constant 0 : index
    %2 = vector.load %arg4[%c0_2, %c0_3] : memref<8x128xbf16, #tpu.memory_space<vmem>>, vector<8x128xbf16>
    %cst = arith.constant dense<0.000000e+00> : vector<256x128xf32>
    %3 = tpu.matmul %1, %2, %cst {dimension_numbers = #tpu.dot_dimension_numbers<[1], [0], [0], [1], [0, 0, 1, 1], [], []>} : vector<256x8xbf16>, vector<8x128xbf16>, vector<256x128xf32> -> vector<256x128xf32>
    %c0_4 = arith.constant 0 : index
    %c0_5 = arith.constant 0 : index
    %4 = vector.load %arg5[%c0_4, %c0_5] : memref<1x128xf32, #tpu.memory_space<vmem>>, vector<1x128xf32>
    %5 = vector.broadcast %4 : vector<1x128xf32> to vector<256x128xf32>
    %6 = arith.addf %3, %5 : vector<256x128xf32>
    %cst_6 = arith.constant 0.000000e+00 : f32
    %7 = vector.broadcast %cst_6 : f32 to vector<256x128xf32>
    %8 = arith.maximumf %6, %7 : vector<256x128xf32>
    %9 = arith.truncf %8 : vector<256x128xf32> to vector<256x128xbf16>
    %c0_7 = arith.constant 0 : index
    %c0_8 = arith.constant 0 : index
    %10 = vector.load %arg6[%c0_7, %c0_8] : memref<128x128xbf16, #tpu.memory_space<vmem>>, vector<128x128xbf16>
    %cst_9 = arith.constant dense<0.000000e+00> : vector<256x128xf32>
    %11 = tpu.matmul %9, %10, %cst_9 {dimension_numbers = #tpu.dot_dimension_numbers<[1], [0], [0], [1], [0, 0, 1, 1], [], []>} : vector<256x128xbf16>, vector<128x128xbf16>, vector<256x128xf32> -> vector<256x128xf32>
    %c0_10 = arith.constant 0 : index
    %c0_11 = arith.constant 0 : index
    %12 = vector.load %arg7[%c0_10, %c0_11] : memref<1x128xf32, #tpu.memory_space<vmem>>, vector<1x128xf32>
    %13 = vector.broadcast %12 : vector<1x128xf32> to vector<256x128xf32>
    %14 = arith.addf %11, %13 : vector<256x128xf32>
    %cst_12 = arith.constant 0.000000e+00 : f32
    %15 = vector.broadcast %cst_12 : f32 to vector<256x128xf32>
    %16 = arith.maximumf %14, %15 : vector<256x128xf32>
    %17 = arith.truncf %16 : vector<256x128xf32> to vector<256x128xbf16>
    %c0_13 = arith.constant 0 : index
    %c0_14 = arith.constant 0 : index
    %18 = vector.load %arg8[%c0_13, %c0_14] : memref<128x128xbf16, #tpu.memory_space<vmem>>, vector<128x128xbf16>
    %cst_15 = arith.constant dense<0.000000e+00> : vector<256x128xf32>
    %19 = tpu.matmul %17, %18, %cst_15 {dimension_numbers = #tpu.dot_dimension_numbers<[1], [0], [0], [1], [0, 0, 1, 1], [], []>} : vector<256x128xbf16>, vector<128x128xbf16>, vector<256x128xf32> -> vector<256x128xf32>
    %c0_16 = arith.constant 0 : index
    %c0_17 = arith.constant 0 : index
    %20 = vector.load %arg9[%c0_16, %c0_17] : memref<1x128xf32, #tpu.memory_space<vmem>>, vector<1x128xf32>
    %21 = vector.broadcast %20 : vector<1x128xf32> to vector<256x128xf32>
    %22 = arith.addf %19, %21 : vector<256x128xf32>
    %cst_18 = arith.constant 0.000000e+00 : f32
    %23 = vector.broadcast %cst_18 : f32 to vector<256x128xf32>
    %24 = arith.maximumf %22, %23 : vector<256x128xf32>
    %25 = arith.truncf %24 : vector<256x128xf32> to vector<256x128xbf16>
    %c0_19 = arith.constant 0 : index
    %c0_20 = arith.constant 0 : index
    %26 = vector.load %arg10[%c0_19, %c0_20] : memref<128x256xbf16, #tpu.memory_space<vmem>>, vector<128x256xbf16>
    %cst_21 = arith.constant dense<0.000000e+00> : vector<256x256xf32>
    %27 = tpu.matmul %25, %26, %cst_21 {dimension_numbers = #tpu.dot_dimension_numbers<[1], [0], [0], [1], [0, 0, 1, 1], [], []>} : vector<256x128xbf16>, vector<128x256xbf16>, vector<256x256xf32> -> vector<256x256xf32>
    %c0_22 = arith.constant 0 : index
    %c0_23 = arith.constant 0 : index
    %28 = vector.load %arg11[%c0_22, %c0_23] : memref<1x256xf32, #tpu.memory_space<vmem>>, vector<1x256xf32>
    %29 = vector.broadcast %28 : vector<1x256xf32> to vector<256x256xf32>
    %30 = arith.addf %27, %29 : vector<256x256xf32>
    %cst_24 = arith.constant 0.000000e+00 : f32
    %31 = vector.broadcast %cst_24 : f32 to vector<256x256xf32>
    %32 = arith.maximumf %30, %31 : vector<256x256xf32>
    %33 = arith.truncf %32 : vector<256x256xf32> to vector<256x256xbf16>
    %c0_25 = arith.constant 0 : index
    %c0_26 = arith.constant 0 : index
    %34 = vector.load %arg12[%c0_25, %c0_26] : memref<256x128xbf16, #tpu.memory_space<vmem>>, vector<256x128xbf16>
    %cst_27 = arith.constant dense<0.000000e+00> : vector<256x128xf32>
    %35 = tpu.matmul %33, %34, %cst_27 {dimension_numbers = #tpu.dot_dimension_numbers<[1], [0], [0], [1], [0, 0, 1, 1], [], []>} : vector<256x256xbf16>, vector<256x128xbf16>, vector<256x128xf32> -> vector<256x128xf32>
    %c0_28 = arith.constant 0 : index
    %c0_29 = arith.constant 0 : index
    %36 = vector.load %arg13[%c0_28, %c0_29] : memref<1x128xf32, #tpu.memory_space<vmem>>, vector<1x128xf32>
    %37 = vector.broadcast %36 : vector<1x128xf32> to vector<256x128xf32>
    %38 = arith.addf %35, %37 : vector<256x128xf32>
    %cst_30 = arith.constant 0.000000e+00 : f32
    %39 = vector.broadcast %cst_30 : f32 to vector<256x128xf32>
    %40 = arith.maximumf %38, %39 : vector<256x128xf32>
    %41 = vector.shape_cast %40 : vector<256x128xf32> to vector<32x8x128xf32>
    %cst_31 = arith.constant dense<0xFF800000> : vector<8x128xf32>
    %42 = vector.multi_reduction <maximumf>, %41, %cst_31 [0] : vector<32x8x128xf32> to vector<8x128xf32>
    %c0_i32 = arith.constant 0 : i32
    %43 = arith.cmpi eq, %arg2, %c0_i32 : i32
    %44 = arith.extui %43 : i1 to i32
    %c0_i32_32 = arith.constant 0 : i32
    %45 = arith.cmpi ne, %44, %c0_i32_32 : i32
    scf.if %45 {
      %c0_35 = arith.constant 0 : index
      %c0_36 = arith.constant 0 : index
      %c0_37 = arith.constant 0 : index
      %c0_38 = arith.constant 0 : index
      %49 = vector.load %arg14[%c0_35, %c0_36, %c0_37, %c0_38] : memref<1x1x8x128xf32, #tpu.memory_space<vmem>>, vector<1x1x8x128xf32>
      %50 = vector.shape_cast %49 : vector<1x1x8x128xf32> to vector<8x128xf32>
      %51 = vector.shape_cast %42 : vector<8x128xf32> to vector<1x1x8x128xf32>
      tpu.vector_store %arg14[%c0_35, %c0_36, %c0_37, %c0_38], %51 {strides = array<i32>} : memref<1x1x8x128xf32, #tpu.memory_space<vmem>>, vector<1x1x8x128xf32>,
    } else {
    }
    %c0_i32_33 = arith.constant 0 : i32
    %46 = arith.cmpi sgt, %arg2, %c0_i32_33 : i32
    %47 = arith.extui %46 : i1 to i32
    %c0_i32_34 = arith.constant 0 : i32
    %48 = arith.cmpi ne, %47, %c0_i32_34 : i32
    scf.if %48 {
      %c0_35 = arith.constant 0 : index
      %c0_36 = arith.constant 0 : index
      %c0_37 = arith.constant 0 : index
      %c0_38 = arith.constant 0 : index
      %49 = vector.load %arg14[%c0_35, %c0_36, %c0_37, %c0_38] : memref<1x1x8x128xf32, #tpu.memory_space<vmem>>, vector<1x1x8x128xf32>
      %50 = vector.shape_cast %49 : vector<1x1x8x128xf32> to vector<8x128xf32>
      %51 = arith.maximumf %50, %42 : vector<8x128xf32>
      %c0_39 = arith.constant 0 : index
      %c0_40 = arith.constant 0 : index
      %c0_41 = arith.constant 0 : index
      %c0_42 = arith.constant 0 : index
      %52 = vector.load %arg14[%c0_39, %c0_40, %c0_41, %c0_42] : memref<1x1x8x128xf32, #tpu.memory_space<vmem>>, vector<1x1x8x128xf32>
      %53 = vector.shape_cast %52 : vector<1x1x8x128xf32> to vector<8x128xf32>
      %54 = vector.shape_cast %51 : vector<8x128xf32> to vector<1x1x8x128xf32>
      tpu.vector_store %arg14[%c0_39, %c0_40, %c0_41, %c0_42], %54 {strides = array<i32>} : memref<1x1x8x128xf32, #tpu.memory_space<vmem>>, vector<1x1x8x128xf32>,
    } else {
    }
    return
  }
  func.func @transform_0(%arg0: i32, %arg1: i32, %arg2: i32) -> (i32, i32, i32) {
    %c3_i32 = arith.constant 3 : i32
    %0 = arith.muli %arg1, %c3_i32 : i32
    %1 = arith.addi %0, %arg2 : i32
    %c0_i32 = arith.constant 0 : i32
    %c0_i32_0 = arith.constant 0 : i32
    return %arg0, %1, %c0_i32 : i32, i32, i32
  }
  func.func @transform_1(%arg0: i32, %arg1: i32, %arg2: i32) -> (i32, i32) {
    %c0_i32 = arith.constant 0 : i32
    %c0_i32_0 = arith.constant 0 : i32
    %c0_i32_1 = arith.constant 0 : i32
    return %c0_i32, %c0_i32_0 : i32, i32
  }
  func.func @transform_2(%arg0: i32, %arg1: i32, %arg2: i32) -> (i32, i32) {
    %c0_i32 = arith.constant 0 : i32
    %c0_i32_0 = arith.constant 0 : i32
    %c0_i32_1 = arith.constant 0 : i32
    return %c0_i32, %c0_i32_0 : i32, i32
  }
  func.func @transform_3(%arg0: i32, %arg1: i32, %arg2: i32) -> (i32, i32) {
    %c0_i32 = arith.constant 0 : i32
    %c0_i32_0 = arith.constant 0 : i32
    %c0_i32_1 = arith.constant 0 : i32
    return %c0_i32, %c0_i32_0 : i32, i32
  }
  func.func @transform_4(%arg0: i32, %arg1: i32, %arg2: i32) -> (i32, i32) {
    %c0_i32 = arith.constant 0 : i32
    %c0_i32_0 = arith.constant 0 : i32
    %c0_i32_1 = arith.constant 0 : i32
    return %c0_i32, %c0_i32_0 : i32, i32
  }
  func.func @transform_5(%arg0: i32, %arg1: i32, %arg2: i32) -> (i32, i32) {
    %c0_i32 = arith.constant 0 : i32
    %c0_i32_0 = arith.constant 0 : i32
    %c0_i32_1 = arith.constant 0 : i32
    return %c0_i32, %c0_i32_0 : i32, i32
  }
  func.func @transform_6(%arg0: i32, %arg1: i32, %arg2: i32) -> (i32, i32) {
    %c0_i32 = arith.constant 0 : i32
    %c0_i32_0 = arith.constant 0 : i32
    %c0_i32_1 = arith.constant 0 : i32
    return %c0_i32, %c0_i32_0 : i32, i32
  }
  func.func @transform_7(%arg0: i32, %arg1: i32, %arg2: i32) -> (i32, i32) {
    %c0_i32 = arith.constant 0 : i32
    %c0_i32_0 = arith.constant 0 : i32
    %c0_i32_1 = arith.constant 0 : i32
    return %c0_i32, %c0_i32_0 : i32, i32
  }
  func.func @transform_8(%arg0: i32, %arg1: i32, %arg2: i32) -> (i32, i32) {
    %c0_i32 = arith.constant 0 : i32
    %c0_i32_0 = arith.constant 0 : i32
    %c0_i32_1 = arith.constant 0 : i32
    return %c0_i32, %c0_i32_0 : i32, i32
  }
  func.func @transform_9(%arg0: i32, %arg1: i32, %arg2: i32) -> (i32, i32) {
    %c0_i32 = arith.constant 0 : i32
    %c0_i32_0 = arith.constant 0 : i32
    %c0_i32_1 = arith.constant 0 : i32
    return %c0_i32, %c0_i32_0 : i32, i32
  }
  func.func @transform_10(%arg0: i32, %arg1: i32, %arg2: i32) -> (i32, i32) {
    %c0_i32 = arith.constant 0 : i32
    %c0_i32_0 = arith.constant 0 : i32
    %c0_i32_1 = arith.constant 0 : i32
    return %c0_i32, %c0_i32_0 : i32, i32
  }
  func.func @transform_11(%arg0: i32, %arg1: i32, %arg2: i32) -> (i32, i32, i32, i32) {
    %c0_i32 = arith.constant 0 : i32
    %c0_i32_0 = arith.constant 0 : i32
    %c0_i32_1 = arith.constant 0 : i32
    return %arg0, %arg1, %c0_i32, %c0_i32_0 : i32, i32, i32, i32
  }
}

</mosaic_0001>

<bundles_post_ra>
// kernel: pc_encoder.1
= control target key start
LH: loop header
LB: loop body
LE: loop exit
PB: predicated region body
PF: predicated region fallthrough
CT: control target
= control target key end

     0   :  { %s2514_s17 = smov 0   ;;  %s2516_s18 = smov 0   ;;  %s3124_s0 = inlined_call_operand.vmem [shape: bf16[2,768,8], index: 0, kind: input, shape index: {}]   ;;  %s3125_s1 = inlined_call_operand.vmem [shape: bf16[8,128], index: 1, kind: input, shape index: {}]   ;;  %s3126_s2 = inlined_call_operand.vmem [shape: f32[1,128], index: 2, kind: input, shape index: {}]   ;;  %s3127_s3 = inlined_call_operand.vmem [shape: bf16[128,128], index: 3, kind: input, shape index: {}]   ;;  %s3128_s4 = inlined_call_operand.vmem [shape: f32[1,128], index: 4, kind: input, shape index: {}]   ;;  %s3129_s5 = inlined_call_operand.vmem [shape: bf16[128,128], index: 5, kind: input, shape index: {}]   ;;  %s3130_s6 = inlined_call_operand.vmem [shape: f32[1,128], index: 6, kind: input, shape index: {}]   ;;  %s3131_s7 = inlined_call_operand.vmem [shape: bf16[128,256], index: 7, kind: input, shape index: {}]   ;;  %s3132_s8 = inlined_call_operand.vmem [shape: f32[1,256], index: 8, kind: input, shape index: {}]   ;;  %s3133_s9 = inlined_call_operand.vmem [shape: bf16[256,128], index: 9, kind: input, shape index: {}]   ;;  %s3134_s10 = inlined_call_operand.vmem [shape: f32[1,128], index: 10, kind: input, shape index: {}]   ;;  %s3135_s11 = inlined_call_operand.vmem [shape: f32[2,1,8,128], index: 11, kind: output, shape index: {}]  }
   0x1   :  { %s2518_s19 = smov 0   ;;  %s2520_s20 = smov 0  }
   0x2   :  { %s2522_s21 = smov 0  }
   0x3 LB: > { %s33_s22 = sadd.s32 1, %s2444_s19  ;;  %s40_s23 = sadd.s32 1, %s2448_s20  ;;  %s2452_s21 = sphi %s2522_s21, %s21_s21   ;;  %s2448_s20 = sphi %s2520_s20, %s3139_s20   ;;  %s2444_s19 = sphi %s2518_s19, %s3138_s19   ;;  %s2440_s18 = sphi %s2516_s18, %s3137_s18   ;;  %s2436_s17 = sphi %s2514_s17, %s3136_s17  }
   0x4   : > { %p34_p0 = scmp.ge.s32.totalorder %s33_s22, 3  ;;  %p2008_p1 = scmp.ge.s32.totalorder %s2452_s21, 1 }
   0x5   : > { %p373_p2 = scmp.lt.s32.totalorder %s2452_s21, 7 }
   0x6   : > { %s3141_s22 = smov (%p34_p0, %s33_s22), 0  ;;  %s3143_s23 = smov (!%p34_p0, %s40_s23), %s2448_s20 }
   0x7   : > { %p374_p3 = pnand %p2008_p1, %p373_p2  ;;  %p42_p4 = scmp.ge.s32.totalorder %s3143_s23, 2 }
   0x8   : > { %s2009_s26 = sshll.u32 (!%p374_p3), %s2436_s17, 5  ;;  %p424_p5 = scmp.lt.s32.totalorder (!%p374_p3), %s2440_s18, 1 }
   0x9   : > { %s3145_s23 = smov (%p42_p4, %s3143_s23), 0  ;;  %377 = sbr.rel (%p374_p3) target bundleno = 1107 (0x453), region = 64 }
   0xa   : > { %p426_p6 = scmp.lt.s32.totalorder (!%p374_p3), %s2009_s26, 95  ;;  %p2284_p7 = scmp.ne.s32.totalorder (!%p374_p3), %s2436_s17, 0 }
   0xe   : > { %v475_v0 = vld [vmem:[%s3125_s1] sm:$0xf]  ;;  %vm609_vm0 = vcmask 1043456   ;;  %s3147_s18 = smov (!%p424_p5, %s2440_s18), 1  ;;  %s3149_s26 = smov (!%p426_p6, %s2009_s26), 95  ;;  %vm560_vm1 = vcmask 64512  }
   0xf   : > { %v611_v1 = vsel %vm609_vm0, %v475_v0, 0  ;;  %s2369_s27 = smul.u32 96, %s3147_s18  ;;  %s2011_s28 = sshll.u32 %s3147_s18, 3  ;;  %v2311_v7 = vld [vmem:[%s3127_s3 + $0x38] sm:$0xff]  ;;  %v2310_v9 = vld [vmem:[%s3127_s3 + $0x30] sm:$0xff]  ;;  %v2309_v10 = vld [vmem:[%s3127_s3 + $0x28] sm:$0xff] }
  0x10   : > { %620 = vmatpush.bf16.msra.mxu0 %v611_v1  ;;  %2352 = vmatpush.bf16.msra.mxu3 %v611_v1  ;;  %s2553_s12 = scalar_lea.vmem %s3135_s11, %s2011_s28  ;;  %v2308_v11 = vld [vmem:[%s3127_s3 + $0x20] sm:$0xff]  ;;  %v2307_v12 = vld [vmem:[%s3127_s3 + $0x18] sm:$0xff]  ;;  %v2306_v14 = vld [vmem:[%s3127_s3 + $0x10] sm:$0xff] }
  0x11   : > { %s429_s13 = sadd.s32 %s2369_s27, %s3149_s26  ;;  %818 = vmatpush.bf16.msra.mxu1 %v2311_v7  ;;  %v2305_v15 = vld [vmem:[%s3127_s3 + $0x8] sm:$0xff]  ;;  %v2304_v16 = vld [vmem:[%s3127_s3] sm:$0xff] }
  0x12   : > { %s2010_s14 = sshll.u32 %s429_s13, 2  ;;  %v2604_v20 = vld [vmem:[%s3126_s2] ss:$0 sm:$0xff] }
  0x13   : > { %s2558_s24 = scalar_lea.vmem %s3124_s0, %s2010_s14 }
  0x14   : > { %v2288_v2 = vld [vmem:[%s2558_s24] sm:$0xff]  ;;  %v2289_v3 = vld [vmem:[%s2558_s24 + $0x8] sm:$0xff]  ;;  %v2290_v4 = vld [vmem:[%s2558_s24 + $0x10] sm:$0xff]  ;;  %2353 = vmatpush.bf16.msrb.mxu3 %v2311_v7 }
  0x15   : > { %2076 = vmatmul.msk.bf16.vlgmr.msra.gmra.mxu0 %vm560_vm1, %v2288_v2  ;;  %v2291_v5 = vld [vmem:[%s2558_s24 + $0x18] sm:$0xff]  ;;  %v2292_v6 = vld [vmem:[%s2558_s24 + $0x20] sm:$0xff]  ;;  %v2293_v8 = vld [vmem:[%s2558_s24 + $0x28] sm:$0xff]  ;;  %819 = vmatpush.bf16.msra.mxu1 %v2310_v9 }
  0x16   : > { %v2294_v13 = vld [vmem:[%s2558_s24 + $0x30] sm:$0xff]  ;;  %v2295_v17 = vld [vmem:[%s2558_s24 + $0x38] sm:$0xff]  ;;  %v2296_v18 = vld [vmem:[%s2558_s24 + $0x40] sm:$0xff] }
  0x17   : > { %v2297_v27 = vld [vmem:[%s2558_s24 + $0x48] sm:$0xff]  ;;  %v2298_v35 = vld [vmem:[%s2558_s24 + $0x50] sm:$0xff]  ;;  %v2299_v44 = vld [vmem:[%s2558_s24 + $0x58] sm:$0xff] }
  0x18   : > { %2354 = vmatpush.bf16.msrb.mxu3 %v2310_v9  ;;  %v2301_v37 = vld [vmem:[%s2558_s24 + $0x68] sm:$0xff]  ;;  %v2302_v46 = vld [vmem:[%s2558_s24 + $0x70] sm:$0xff]  ;;  %v2300_v53 = vld [vmem:[%s2558_s24 + $0x60] sm:$0xff] }
  0x19   : > { %820 = vmatpush.bf16.msra.mxu1 %v2309_v10  ;;  %2089 = vmatmul.msk.bf16.vlgmr.msra.gmra.mxu3 %vm560_vm1, %v2301_v37  ;;  %v2303_v55 = vld [vmem:[%s2558_s24 + $0x78] sm:$0xff]  ;;  %v2316_v9 = vld [vmem:[%s3129_s5 + $0x20] sm:$0xff] }
  0x1a   : > { %v2319_v2 = vld [vmem:[%s3129_s5 + $0x38] sm:$0xff] }
  0x1b   : > { %1023 = vmatpush.bf16.msra.mxu2 %v2319_v2 }
  0x1c   : > { %2355 = vmatpush.bf16.msrb.mxu3 %v2309_v10 }
  0x1d   : > { %821 = vmatpush.bf16.msra.mxu1 %v2308_v11 }
  0x20   : > { %2356 = vmatpush.bf16.msrb.mxu3 %v2308_v11 }
  0x21   : > { %822 = vmatpush.bf16.msra.mxu1 %v2307_v12 }
  0x24   : > { %2357 = vmatpush.bf16.msrb.mxu3 %v2307_v12 }
  0x25   : > { %2077 = vmatmul.msk.bf16.gmra.mxu0 %vm560_vm1, %v2289_v3  ;;  %823 = vmatpush.bf16.msra.mxu1 %v2306_v14 }
  0x28   : > { %2358 = vmatpush.bf16.msrb.mxu3 %v2306_v14 }
  0x29   : > { %824 = vmatpush.bf16.msra.mxu1 %v2305_v15  ;;  %2090 = vmatmul.msk.bf16.gmra.mxu3 %vm560_vm1, %v2302_v46 }
  0x2c   : > { %2359 = vmatpush.bf16.msrb.mxu3 %v2305_v15 }
  0x2d   : > { %825 = vmatpush.bf16.msra.mxu1 %v2304_v16 }
  0x30   : > { %2360 = vmatpush.bf16.msrb.mxu3 %v2304_v16 }
  0x34   : > { %2361 = vmatpush.bf16.msra.mxu3 %v2319_v2  ;;  %v2216_v2 = vld [vmem:[%s3131_s7 + $0x78] sm:$0xf0] }
  0x35   : > { %2078 = vmatmul.msk.bf16.gmra.mxu0 %vm560_vm1, %v2290_v4 }
  0x39   : > { %2091 = vmatmul.msk.bf16.gmra.mxu3 %vm560_vm1, %v2303_v55 }
  0x45   : > { %2079 = vmatmul.msk.bf16.gmra.mxu0 %vm560_vm1, %v2291_v5 }
  0x55   : > { %2080 = vmatmul.msk.bf16.gmra.mxu0 %vm560_vm1, %v2292_v6  ;;  %v2318_v6 = vld [vmem:[%s3129_s5 + $0x30] sm:$0xff] }
  0x56   : > { %1024 = vmatpush.bf16.msra.mxu2 %v2318_v6  ;;  %2362 = vmatpush.bf16.msra.mxu3 %v2318_v6 }
  0x65   : > { %2081 = vmatmul.msk.bf16.gmra.mxu0 %vm560_vm1, %v2293_v8  ;;  %v2317_v8 = vld [vmem:[%s3129_s5 + $0x28] sm:$0xff] }
  0x66   : > { %1025 = vmatpush.bf16.msra.mxu2 %v2317_v8  ;;  %2363 = vmatpush.bf16.msra.mxu3 %v2317_v8 }
  0x6a   : > { %1026 = vmatpush.bf16.msra.mxu2 %v2316_v9  ;;  %2364 = vmatpush.bf16.msra.mxu3 %v2316_v9 }
  0x75   : > { %2082 = vmatmul.msk.bf16.gmra.mxu0 %vm560_vm1, %v2294_v13  ;;  %v2315_v13 = vld [vmem:[%s3129_s5 + $0x18] sm:$0xff] }
  0x76   : > { %1027 = vmatpush.bf16.msra.mxu2 %v2315_v13  ;;  %2365 = vmatpush.bf16.msra.mxu3 %v2315_v13 }
  0x85   : > { %2083 = vmatmul.msk.bf16.gmra.mxu0 %vm560_vm1, %v2295_v17  ;;  %v2314_v17 = vld [vmem:[%s3129_s5 + $0x10] sm:$0xff] }
  0x86   : > { %1028 = vmatpush.bf16.msra.mxu2 %v2314_v17  ;;  %2366 = vmatpush.bf16.msra.mxu3 %v2314_v17 }
  0x92   : > { %v622_v19 = vpop.f32.mrf.mxu0 }
  0x93   : > { %v623_v21 = vadd.f32 %v2604_v20, %v622_v19  ;;  %v2313_v19 = vld [vmem:[%s3129_s5 + $0x8] sm:$0xff] }
  0x94   : > { %1029 = vmatpush.bf16.msra.mxu2 %v2313_v19  ;;  %2367 = vmatpush.bf16.msra.mxu3 %v2313_v19 }
  0x95   : > { %2084 = vmatmul.msk.bf16.gmra.mxu0 %vm560_vm1, %v2296_v18  ;;  %v702_v24 = vmax.f32 %v623_v21, 0.0  ;;  %v2312_v21 = vld [vmem:[%s3129_s5] sm:$0xff] }
  0x98   : > { %1030 = vmatpush.bf16.msra.mxu2 %v2312_v21  ;;  %2368 = vmatpush.bf16.msra.mxu3 %v2312_v21 }
  0x9a   : > { %v624_v22 = vpop.f32.mrf.mxu0 }
  0x9b   : > { %v625_v23 = vadd.f32 %v2604_v20, %v624_v22 }
  0x9c   : > { %v687_v19 = vpop.f32.mrf.mxu3 }
  0x9d   : > { %v703_v25 = vmax.f32 %v625_v23, 0.0 }
  0x9f   : > { %v734_v26 = vpack.c.bf16 %v703_v25, %v702_v24 }
  0xa1   : > { %826 = vmatmul.bf16.vlgmr.msra.gmra.mxu1 %v734_v26 }
  0xa2   : > { %v627_v28 = vpop.f32.mrf.mxu0 }
  0xa3   : > { %v628_v29 = vadd.f32 %v2604_v20, %v627_v28 }
  0xa5   : > { %2085 = vmatmul.msk.bf16.gmra.mxu0 %vm560_vm1, %v2297_v27  ;;  %v704_v32 = vmax.f32 %v628_v29, 0.0 }
  0xaa   : > { %v629_v30 = vpop.f32.mrf.mxu0 }
  0xab   : > { %v630_v31 = vadd.f32 %v2604_v20, %v629_v30 }
  0xad   : > { %v705_v33 = vmax.f32 %v630_v31, 0.0 }
  0xaf   : > { %v735_v34 = vpack.c.bf16 %v705_v33, %v704_v32 }
  0xb1   : > { %831 = vmatmul.bf16.gmra.mxu1 %v735_v34 }
  0xb2   : > { %v632_v36 = vpop.f32.mrf.mxu0 }
  0xb3   : > { %v633_v38 = vadd.f32 %v2604_v20, %v632_v36  ;;  %v2666_v36 = vld [vmem:[%s3128_s4] ss:$0 sm:$0xff] }
  0xb5   : > { %2086 = vmatmul.msk.bf16.gmra.mxu0 %vm560_vm1, %v2298_v35  ;;  %v706_v41 = vmax.f32 %v633_v38, 0.0 }
  0xba   : > { %v634_v39 = vpop.f32.mrf.mxu0 }
  0xbb   : > { %v635_v40 = vadd.f32 %v2604_v20, %v634_v39 }
  0xbd   : > { %v707_v42 = vmax.f32 %v635_v40, 0.0 }
  0xbf   : > { %v736_v43 = vpack.c.bf16 %v707_v42, %v706_v41 }
  0xc1   : > { %836 = vmatmul.bf16.gmra.mxu1 %v736_v43 }
  0xc2   : > { %v637_v45 = vpop.f32.mrf.mxu0 }
  0xc3   : > { %v638_v47 = vadd.f32 %v2604_v20, %v637_v45 }
  0xc5   : > { %2087 = vmatmul.msk.bf16.gmra.mxu0 %vm560_vm1, %v2299_v44  ;;  %v708_v50 = vmax.f32 %v638_v47, 0.0 }
  0xca   : > { %v639_v48 = vpop.f32.mrf.mxu0 }
  0xcb   : > { %v640_v49 = vadd.f32 %v2604_v20, %v639_v48 }
  0xcd   : > { %v709_v51 = vmax.f32 %v640_v49, 0.0 }
  0xcf   : > { %v737_v52 = vpack.c.bf16 %v709_v51, %v708_v50 }
  0xd1   : > { %841 = vmatmul.bf16.gmra.mxu1 %v737_v52 }
  0xd2   : > { %v642_v54 = vpop.f32.mrf.mxu0 }
  0xd3   : > { %v643_v56 = vadd.f32 %v2604_v20, %v642_v54 }
  0xd5   : > { %2088 = vmatmul.msk.bf16.gmra.mxu0 %vm560_vm1, %v2300_v53  ;;  %v710_v59 = vmax.f32 %v643_v56, 0.0 }
  0xda   : > { %v644_v57 = vpop.f32.mrf.mxu0 }
  0xdb   : > { %v645_v58 = vadd.f32 %v2604_v20, %v644_v57 }
  0xdd   : > { %v711_v60 = vmax.f32 %v645_v58, 0.0 }
  0xdf   : > { %v738_v61 = vpack.c.bf16 %v711_v60, %v710_v59 }
  0xe1   : > { %846 = vmatmul.bf16.gmra.mxu1 %v738_v61 }
  0xe2   : > { %v647_v62 = vpop.f32.mrf.mxu0 }
  0xe3   : > { %v648_v63 = vadd.f32 %v2604_v20, %v647_v62 }
  0xe5   : > { %v712_v3 = vmax.f32 %v648_v63, 0.0 }
  0xea   : > { %v649_v0 = vpop.f32.mrf.mxu0 }
  0xeb   : > { %v650_v1 = vadd.f32 %v2604_v20, %v649_v0 }
  0xed   : > { %v713_v4 = vmax.f32 %v650_v1, 0.0  ;;  %v2334_v1 = vld [vmem:[%s3131_s7 + $0x74] sm:$0xf] }
  0xef   : > { %v739_v5 = vpack.c.bf16 %v713_v4, %v712_v3  ;;  %v2219_v4 = vor.u32 %v2334_v1, %v2216_v2 }
  0xf1   : > { %851 = vmatmul.bf16.gmra.mxu1 %v739_v5  ;;  %1351 = vmatpush.bf16.msrb.mxu0 %v2219_v4 }
  0xf2   : > { %v652_v7 = vpop.f32.mrf.mxu0 }
  0xf3   : > { %v653_v10 = vadd.f32 %v2604_v20, %v652_v7 }
  0xf5   : > { %v714_v14 = vmax.f32 %v653_v10, 0.0 }
  0xfa   : > { %v654_v11 = vpop.f32.mrf.mxu0 }
  0xfb   : > { %v655_v12 = vadd.f32 %v2604_v20, %v654_v11 }
  0xfd   : > { %v715_v15 = vmax.f32 %v655_v12, 0.0 }
  0xff   : > { %v740_v16 = vpack.c.bf16 %v715_v15, %v714_v14 }
 0x101   : > { %856 = vmatmul.bf16.gmra.mxu1 %v740_v16 }
 0x102   : > { %v657_v18 = vpop.f32.mrf.mxu0 }
 0x103   : > { %v658_v22 = vadd.f32 %v2604_v20, %v657_v18 }
 0x105   : > { %v716_v25 = vmax.f32 %v658_v22, 0.0 }
 0x10a   : > { %v659_v23 = vpop.f32.mrf.mxu0 }
 0x10b   : > { %v660_v24 = vadd.f32 %v2604_v20, %v659_v23 }
 0x10d   : > { %v717_v26 = vmax.f32 %v660_v24, 0.0 }
 0x10f   : > { %v741_v27 = vpack.c.bf16 %v717_v26, %v716_v25 }
 0x111   : > { %861 = vmatmul.bf16.gmra.mxu1 %v741_v27 }
 0x112   : > { %v662_v28 = vpop.f32.mrf.mxu0 }
 0x113   : > { %v663_v29 = vadd.f32 %v2604_v20, %v662_v28 }
 0x115   : > { %v718_v32 = vmax.f32 %v663_v29, 0.0 }
 0x11a   : > { %v664_v30 = vpop.f32.mrf.mxu0 }
 0x11b   : > { %v665_v31 = vadd.f32 %v2604_v20, %v664_v30  ;;  %v689_v30 = vpop.f32.mrf.mxu3 }
 0x11d   : > { %v719_v33 = vmax.f32 %v665_v31, 0.0 }
 0x11e   : > { %v827_v34 = vpop.f32.mrf.mxu1 }
 0x11f   : > { %v742_v35 = vpack.c.bf16 %v719_v33, %v718_v32  ;;  %v828_v38 = vadd.f32 %v2666_v36, %v827_v34 }
 0x121   : > { %866 = vmatmul.bf16.gmra.mxu1 %v742_v35  ;;  %v907_v41 = vmax.f32 %v828_v38, 0.0  ;;  %v2332_v35 = vld [vmem:[%s3131_s7 + $0x64] sm:$0xf] }
 0x122   : > { %v667_v37 = vpop.f32.mrf.mxu0 }
 0x123   : > { %v668_v42 = vadd.f32 %v2604_v20, %v667_v37  ;;  %v2208_v37 = vld [vmem:[%s3131_s7 + $0x68] sm:$0xf0] }
 0x124   : > { %v2211_v38 = vor.u32 %v2332_v35, %v2208_v37  ;;  %v2320_v35 = vld [vmem:[%s3131_s7 + $0x4] sm:$0xf]  ;;  %v2160_v37 = vld [vmem:[%s3131_s7 + $0x8] sm:$0xf0] }
 0x125   : > { %v720_v47 = vmax.f32 %v668_v42, 0.0  ;;  %v688_v42 = vadd.f32 %v2604_v20, %v687_v19  ;;  %v2184_v19 = vld [vmem:[%s3131_s7 + $0x38] sm:$0xf0] }
 0x126   : > { %v829_v39 = vpop.f32.mrf.mxu1  ;;  %1352 = vmatpush.bf16.msrb.mxu0 %v2211_v38  ;;  %v2163_v38 = vor.u32 %v2320_v35, %v2160_v37  ;;  %v2331_v35 = vld [vmem:[%s3131_s7 + $0x54] sm:$0xf0] }
 0x127   : > { %v830_v40 = vadd.f32 %v2666_v36, %v829_v39 }
 0x129   : > { %v908_v43 = vmax.f32 %v830_v40, 0.0 }
 0x12a   : > { %v669_v44 = vpop.f32.mrf.mxu0 }
 0x12b   : > { %v670_v45 = vadd.f32 %v2604_v20, %v669_v44  ;;  %v939_v46 = vpack.c.bf16 %v908_v43, %v907_v41  ;;  %v692_v41 = vpop.f32.mrf.mxu3  ;;  %v690_v43 = vadd.f32 %v2604_v20, %v689_v30 }
 0x12d   : > { %v721_v48 = vmax.f32 %v670_v45, 0.0  ;;  %1031 = vmatmul.bf16.vlgmr.msra.gmra.mxu2 %v939_v46 }
 0x12e   : > { %v832_v49 = vpop.f32.mrf.mxu1 }
 0x12f   : > { %v743_v50 = vpack.c.bf16 %v721_v48, %v720_v47  ;;  %v833_v52 = vadd.f32 %v2666_v36, %v832_v49  ;;  %v728_v47 = vmax.f32 %v688_v42, 0.0  ;;  %v729_v48 = vmax.f32 %v690_v43, 0.0 }
 0x131   : > { %871 = vmatmul.bf16.gmra.mxu1 %v743_v50  ;;  %v909_v55 = vmax.f32 %v833_v52, 0.0 }
 0x132   : > { %v672_v51 = vpop.f32.mrf.mxu0 }
 0x133   : > { %v673_v56 = vadd.f32 %v2604_v20, %v672_v51  ;;  %v747_v51 = vpack.c.bf16 %v729_v48, %v728_v47  ;;  %v694_v52 = vpop.f32.mrf.mxu3 }
 0x135   : > { %v722_v61 = vmax.f32 %v673_v56, 0.0  ;;  %v695_v56 = vadd.f32 %v2604_v20, %v694_v52 }
 0x136   : > { %v834_v53 = vpop.f32.mrf.mxu1 }
 0x137   : > { %v835_v54 = vadd.f32 %v2666_v36, %v834_v53  ;;  %v731_v1 = vmax.f32 %v695_v56, 0.0 }
 0x139   : > { %v910_v57 = vmax.f32 %v835_v54, 0.0 }
 0x13a   : > { %v674_v58 = vpop.f32.mrf.mxu0 }
 0x13b   : > { %v675_v59 = vadd.f32 %v2604_v20, %v674_v58  ;;  %v940_v60 = vpack.c.bf16 %v910_v57, %v909_v55  ;;  %v693_v55 = vadd.f32 %v2604_v20, %v692_v41 }
 0x13d   : > { %v723_v62 = vmax.f32 %v675_v59, 0.0  ;;  %1036 = vmatmul.bf16.gmra.mxu2 %v940_v60  ;;  %v2330_v60 = vld [vmem:[%s3131_s7 + $0x54] sm:$0xf] }
 0x13e   : > { %v837_v63 = vpop.f32.mrf.mxu1 }
 0x13f   : > { %v744_v0 = vpack.c.bf16 %v723_v62, %v722_v61  ;;  %v838_v5 = vadd.f32 %v2666_v36, %v837_v63  ;;  %v2200_v61 = vld [vmem:[%s3131_s7 + $0x58] sm:$0xf0]  ;;  %v697_v62 = vpop.f32.mrf.mxu3 }
 0x140   : > { %v2203_v63 = vor.u32 %v2330_v60, %v2200_v61 }
 0x141   : > { %876 = vmatmul.bf16.gmra.mxu1 %v744_v0  ;;  %v911_v8 = vmax.f32 %v838_v5, 0.0  ;;  %v730_v0 = vmax.f32 %v693_v55, 0.0 }
 0x142   : > { %v677_v3 = vpop.f32.mrf.mxu0  ;;  %1353 = vmatpush.bf16.msrb.mxu0 %v2203_v63 }
 0x143   : > { %v678_v9 = vadd.f32 %v2604_v20, %v677_v3  ;;  %v748_v4 = vpack.c.bf16 %v731_v1, %v730_v0 }
 0x145   : > { %v724_v14 = vmax.f32 %v678_v9, 0.0 }
 0x146   : > { %v839_v6 = vpop.f32.mrf.mxu1 }
 0x147   : > { %v840_v7 = vadd.f32 %v2666_v36, %v839_v6  ;;  %v699_v5 = vpop.f32.mrf.mxu3 }
 0x148   : > { %v700_v9 = vadd.f32 %v2604_v20, %v699_v5 }
 0x149   : > { %v912_v10 = vmax.f32 %v840_v7, 0.0 }
 0x14a   : > { %v679_v11 = vpop.f32.mrf.mxu0 }
 0x14b   : > { %v680_v12 = vadd.f32 %v2604_v20, %v679_v11  ;;  %v941_v13 = vpack.c.bf16 %v912_v10, %v911_v8  ;;  %v698_v8 = vadd.f32 %v2604_v20, %v697_v62 }
 0x14d   : > { %v725_v15 = vmax.f32 %v680_v12, 0.0  ;;  %1041 = vmatmul.bf16.gmra.mxu2 %v941_v13  ;;  %v2328_v13 = vld [vmem:[%s3131_s7 + $0x44] sm:$0xf] }
 0x14e   : > { %v842_v16 = vpop.f32.mrf.mxu1 }
 0x14f   : > { %v745_v17 = vpack.c.bf16 %v725_v15, %v724_v14  ;;  %v843_v21 = vadd.f32 %v2666_v36, %v842_v16  ;;  %v2192_v14 = vld [vmem:[%s3131_s7 + $0x48] sm:$0xf0]  ;;  %v732_v16 = vmax.f32 %v698_v8, 0.0 }
 0x150   : > { %v2195_v15 = vor.u32 %v2328_v13, %v2192_v14  ;;  %v2214_v14 = vld [vmem:[%s3131_s7 + $0x70] sm:$0xf] }
 0x151   : > { %881 = vmatmul.bf16.gmra.mxu1 %v745_v17  ;;  %v913_v24 = vmax.f32 %v843_v21, 0.0  ;;  %v733_v17 = vmax.f32 %v700_v9, 0.0 }
 0x152   : > { %v682_v18 = vpop.f32.mrf.mxu0  ;;  %1354 = vmatpush.bf16.msrb.mxu0 %v2195_v15  ;;  %v2335_v15 = vld [vmem:[%s3131_s7 + $0x74] sm:$0xf0] }
 0x153   : > { %v683_v25 = vadd.f32 %v2604_v20, %v682_v18 }
 0x155   : > { %v726_v31 = vmax.f32 %v683_v25, 0.0  ;;  %v2176_v25 = vld [vmem:[%s3131_s7 + $0x28] sm:$0xf0] }
 0x156   : > { %v844_v22 = vpop.f32.mrf.mxu1 }
 0x157   : > { %v845_v23 = vadd.f32 %v2666_v36, %v844_v22 }
 0x159   : > { %v914_v26 = vmax.f32 %v845_v23, 0.0  ;;  %v749_v23 = vpack.c.bf16 %v733_v17, %v732_v16  ;;  %v2215_v16 = vor.u32 %v2335_v15, %v2214_v14  ;;  %v2342_v14 = vld [vmem:[%s3133_s9 + $0x30] sm:$0xff] }
 0x15a   : > { %v684_v27 = vpop.f32.mrf.mxu0 }
 0x15b   : > { %v685_v28 = vadd.f32 %v2604_v20, %v684_v27  ;;  %v942_v29 = vpack.c.bf16 %v914_v26, %v913_v24  ;;  %v2326_v20 = vld [vmem:[%s3131_s7 + $0x34] sm:$0xf]  ;;  %v2324_v24 = vld [vmem:[%s3131_s7 + $0x24] sm:$0xf] }
 0x15c   : > { %v2187_v22 = vor.u32 %v2326_v20, %v2184_v19  ;;  %v2179_v26 = vor.u32 %v2324_v24, %v2176_v25 }
 0x15d   : > { %v727_v32 = vmax.f32 %v685_v28, 0.0  ;;  %1046 = vmatmul.bf16.gmra.mxu2 %v942_v29  ;;  %v2322_v28 = vld [vmem:[%s3131_s7 + $0x14] sm:$0xf]  ;;  %v2168_v29 = vld [vmem:[%s3131_s7 + $0x18] sm:$0xf0] }
 0x15e   : > { %v847_v33 = vpop.f32.mrf.mxu1  ;;  %1355 = vmatpush.bf16.msrb.mxu0 %v2187_v22 }
 0x15f   : > { %v746_v34 = vpack.c.bf16 %v727_v32, %v726_v31  ;;  %v848_v39 = vadd.f32 %v2666_v36, %v847_v33  ;;  %v2171_v31 = vor.u32 %v2322_v28, %v2168_v29  ;;  %v2206_v28 = vld [vmem:[%s3131_s7 + $0x60] sm:$0xf]  ;;  %v2333_v29 = vld [vmem:[%s3131_s7 + $0x64] sm:$0xf0] }
 0x161   : > { %886 = vmatmul.bf16.vlgmr.msrb.gmra.mxu3 %v746_v34  ;;  %v915_v45 = vmax.f32 %v848_v39, 0.0 }
 0x162   : > { %1356 = vmatpush.bf16.msrb.mxu0 %v2179_v26  ;;  %1262 = vmatpush.bf16.msrb.mxu3 %v2215_v16 }
 0x166   : > { %v849_v40 = vpop.f32.mrf.mxu1  ;;  %1357 = vmatpush.bf16.msrb.mxu0 %v2171_v31 }
 0x167   : > { %v850_v44 = vadd.f32 %v2666_v36, %v849_v40 }
 0x169   : > { %v916_v46 = vmax.f32 %v850_v44, 0.0 }
 0x16a   : > { %1358 = vmatpush.bf16.msrb.mxu0 %v2163_v38 }
 0x16b   : > { %v943_v49 = vpack.c.bf16 %v916_v46, %v915_v45 }
 0x16d   : > { %1051 = vmatmul.bf16.gmra.mxu2 %v943_v49  ;;  %v2751_v49 = vld [vmem:[%s3130_s6] ss:$0 sm:$0xff] }
 0x16e   : > { %v852_v50 = vpop.f32.mrf.mxu1 }
 0x16f   : > { %v853_v53 = vadd.f32 %v2666_v36, %v852_v50 }
 0x171   : > { %891 = vmatmul.bf16.gmra.mxu3 %v747_v51  ;;  %v917_v58 = vmax.f32 %v853_v53, 0.0 }
 0x176   : > { %v854_v54 = vpop.f32.mrf.mxu1 }
 0x177   : > { %v855_v57 = vadd.f32 %v2666_v36, %v854_v54 }
 0x179   : > { %v918_v59 = vmax.f32 %v855_v57, 0.0 }
 0x17b   : > { %v944_v2 = vpack.c.bf16 %v918_v59, %v917_v58 }
 0x17d   : > { %1056 = vmatmul.bf16.gmra.mxu2 %v944_v2 }
 0x17e   : > { %v857_v3 = vpop.f32.mrf.mxu1 }
 0x17f   : > { %v858_v6 = vadd.f32 %v2666_v36, %v857_v3 }
 0x181   : > { %896 = vmatmul.bf16.gmra.mxu3 %v748_v4  ;;  %v919_v11 = vmax.f32 %v858_v6, 0.0 }
 0x186   : > { %v859_v7 = vpop.f32.mrf.mxu1 }
 0x187   : > { %v860_v10 = vadd.f32 %v2666_v36, %v859_v7 }
 0x189   : > { %v920_v12 = vmax.f32 %v860_v10, 0.0 }
 0x18b   : > { %v945_v18 = vpack.c.bf16 %v920_v12, %v919_v11 }
 0x18d   : > { %1061 = vmatmul.bf16.gmra.mxu2 %v945_v18 }
 0x18e   : > { %v862_v21 = vpop.f32.mrf.mxu1 }
 0x18f   : > { %v863_v27 = vadd.f32 %v2666_v36, %v862_v21 }
 0x191   : > { %901 = vmatmul.bf16.gmra.mxu3 %v749_v23  ;;  %v921_v33 = vmax.f32 %v863_v27, 0.0 }
 0x196   : > { %v864_v30 = vpop.f32.mrf.mxu1 }
 0x197   : > { %v865_v32 = vadd.f32 %v2666_v36, %v864_v30  ;;  %v2207_v30 = vor.u32 %v2333_v29, %v2206_v28  ;;  %v2321_v28 = vld [vmem:[%s3131_s7 + $0x4] sm:$0xf0] }
 0x199   : > { %v922_v34 = vmax.f32 %v865_v32, 0.0  ;;  %1263 = vmatpush.bf16.msrb.mxu3 %v2207_v30 }
 0x19b   : > { %v946_v39 = vpack.c.bf16 %v922_v34, %v921_v33  ;;  %v2351_v33 = vld [vmem:[%s3133_s9 + $0x78] sm:$0xff]  ;;  %v2198_v34 = vld [vmem:[%s3131_s7 + $0x50] sm:$0xf] }
 0x19c   : > { %v2199_v38 = vor.u32 %v2331_v35, %v2198_v34  ;;  %1757 = vmatpush.bf16.msrb.mxu2 %v2351_v33 }
 0x19d   : > { %1066 = vmatmul.bf16.gmra.mxu2 %v946_v39 }
 0x19e   : > { %v867_v40 = vpop.f32.mrf.mxu1  ;;  %1264 = vmatpush.bf16.msrb.mxu3 %v2199_v38 }
 0x19f   : > { %v868_v41 = vadd.f32 %v2666_v36, %v867_v40  ;;  %v2343_v40 = vld [vmem:[%s3133_s9 + $0x38] sm:$0xff] }
 0x1a0   : > { %1668 = vmatpush.bf16.msrb.mxu1 %v2343_v40  ;;  %v2341_v40 = vld [vmem:[%s3133_s9 + $0x28] sm:$0xff] }
 0x1a1   : > { %v923_v44 = vmax.f32 %v868_v41, 0.0 }
 0x1a4   : > { %1669 = vmatpush.bf16.msrb.mxu1 %v2342_v14 }
 0x1a6   : > { %v869_v42 = vpop.f32.mrf.mxu1 }
 0x1a7   : > { %v870_v43 = vadd.f32 %v2666_v36, %v869_v42 }
 0x1a8   : > { %1670 = vmatpush.bf16.msrb.mxu1 %v2341_v40 }
 0x1a9   : > { %v924_v45 = vmax.f32 %v870_v43, 0.0 }
 0x1ab   : > { %v947_v46 = vpack.c.bf16 %v924_v45, %v923_v44 }
 0x1ad   : > { %1071 = vmatmul.bf16.gmra.mxu2 %v947_v46  ;;  %v2190_v46 = vld [vmem:[%s3131_s7 + $0x40] sm:$0xf] }
 0x1ae   : > { %v872_v47 = vpop.f32.mrf.mxu1 }
 0x1af   : > { %v873_v50 = vadd.f32 %v2666_v36, %v872_v47  ;;  %v2329_v47 = vld [vmem:[%s3131_s7 + $0x44] sm:$0xf0] }
 0x1b0   : > { %v1032_v48 = vpop.f32.mrf.mxu2 }
 0x1b1   : > { %v1033_v52 = vadd.f32 %v2751_v49, %v1032_v48  ;;  %v925_v55 = vmax.f32 %v873_v50, 0.0  ;;  %v2191_v50 = vor.u32 %v2329_v47, %v2190_v46  ;;  %v2347_v46 = vld [vmem:[%s3133_s9 + $0x58] sm:$0xff] }
 0x1b3   : > { %v1112_v58 = vmax.f32 %v1033_v52, 0.0  ;;  %1265 = vmatpush.bf16.msrb.mxu3 %v2191_v50 }
 0x1b6   : > { %v874_v51 = vpop.f32.mrf.mxu1 }
 0x1b7   : > { %v875_v53 = vadd.f32 %v2666_v36, %v874_v51 }
 0x1b8   : > { %v1034_v54 = vpop.f32.mrf.mxu2 }
 0x1b9   : > { %v926_v56 = vmax.f32 %v875_v53, 0.0  ;;  %v1035_v57 = vadd.f32 %v2751_v49, %v1034_v54 }
 0x1bb   : > { %v1113_v59 = vmax.f32 %v1035_v57, 0.0  ;;  %v948_v60 = vpack.c.bf16 %v926_v56, %v925_v55  ;;  %v2182_v57 = vld [vmem:[%s3131_s7 + $0x30] sm:$0xf] }
 0x1bd   : > { %v2757_v61 = vpack.c.bf16 %v1113_v59, %v1112_v58  ;;  %1076 = vmatmul.bf16.gmra.mxu2 %v948_v60  ;;  %v2327_v58 = vld [vmem:[%s3131_s7 + $0x34] sm:$0xf0] }
 0x1be   : > { %v877_v62 = vpop.f32.mrf.mxu1  ;;  %v2183_v60 = vor.u32 %v2327_v58, %v2182_v57 }
 0x1bf   : > { %1359 = vmatmul.bf16.vlgmr.msrb.gmra.mxu0 %v2757_v61  ;;  %v878_v0 = vadd.f32 %v2666_v36, %v877_v62 }
 0x1c0   : > { %v1037_v63 = vpop.f32.mrf.mxu2  ;;  %1266 = vmatpush.bf16.msrb.mxu3 %v2183_v60  ;;  %v2345_v60 = vld [vmem:[%s3133_s9 + $0x48] sm:$0xff] }
 0x1c1   : > { %v1038_v2 = vadd.f32 %v2751_v49, %v1037_v63  ;;  %v927_v5 = vmax.f32 %v878_v0, 0.0 }
 0x1c3   : > { %v1114_v8 = vmax.f32 %v1038_v2, 0.0 }
 0x1c6   : > { %v879_v1 = vpop.f32.mrf.mxu1 }
 0x1c7   : > { %v880_v3 = vadd.f32 %v2666_v36, %v879_v1 }
 0x1c8   : > { %v1039_v4 = vpop.f32.mrf.mxu2 }
 0x1c9   : > { %v928_v6 = vmax.f32 %v880_v3, 0.0  ;;  %v1040_v7 = vadd.f32 %v2751_v49, %v1039_v4  ;;  %v2350_v4 = vld [vmem:[%s3133_s9 + $0x70] sm:$0xff] }
 0x1ca   : > { %1758 = vmatpush.bf16.msrb.mxu2 %v2350_v4  ;;  %v2340_v4 = vld [vmem:[%s3133_s9 + $0x20] sm:$0xff] }
 0x1cb   : > { %v1115_v9 = vmax.f32 %v1040_v7, 0.0  ;;  %v949_v10 = vpack.c.bf16 %v928_v6, %v927_v5  ;;  %v2174_v5 = vld [vmem:[%s3131_s7 + $0x20] sm:$0xf]  ;;  %v2325_v6 = vld [vmem:[%s3131_s7 + $0x24] sm:$0xf0]  ;;  %1671 = vmatpush.bf16.msrb.mxu1 %v2340_v4 }
 0x1cd   : > { %1081 = vmatmul.bf16.gmra.mxu2 %v949_v10  ;;  %v2764_v11 = vpack.c.bf16 %v1115_v9, %v1114_v8  ;;  %v2175_v8 = vor.u32 %v2325_v6, %v2174_v5 }
 0x1ce   : > { %v882_v12 = vpop.f32.mrf.mxu1 }
 0x1cf   : > { %1364 = vmatmul.bf16.gmra.mxu0 %v2764_v11  ;;  %v883_v17 = vadd.f32 %v2666_v36, %v882_v12  ;;  %1267 = vmatpush.bf16.msrb.mxu3 %v2175_v8 }
 0x1d0   : > { %v1042_v13 = vpop.f32.mrf.mxu2 }
 0x1d1   : > { %v1043_v20 = vadd.f32 %v2751_v49, %v1042_v13  ;;  %v929_v22 = vmax.f32 %v883_v17, 0.0  ;;  %v2166_v17 = vld [vmem:[%s3131_s7 + $0x10] sm:$0xf] }
 0x1d3   : > { %v1116_v25 = vmax.f32 %v1043_v20, 0.0 }
 0x1d6   : > { %v884_v18 = vpop.f32.mrf.mxu1 }
 0x1d7   : > { %v885_v19 = vadd.f32 %v2666_v36, %v884_v18  ;;  %v2323_v18 = vld [vmem:[%s3131_s7 + $0x14] sm:$0xf0] }
 0x1d8   : > { %v1044_v21 = vpop.f32.mrf.mxu2 }
 0x1d9   : > { %v930_v23 = vmax.f32 %v885_v19, 0.0  ;;  %v1045_v24 = vadd.f32 %v2751_v49, %v1044_v21  ;;  %v2167_v19 = vor.u32 %v2323_v18, %v2166_v17 }
 0x1db   : > { %v1117_v26 = vmax.f32 %v1045_v24, 0.0  ;;  %v950_v27 = vpack.c.bf16 %v930_v23, %v929_v22  ;;  %1268 = vmatpush.bf16.msrb.mxu3 %v2167_v19 }
 0x1dd   : > { %1086 = vmatmul.bf16.gmra.mxu2 %v950_v27  ;;  %v2783_v31 = vpack.c.bf16 %v1117_v26, %v1116_v25  ;;  %v2158_v27 = vld [vmem:[%s3131_s7] sm:$0xf] }
 0x1de   : > { %v2159_v30 = vor.u32 %v2321_v28, %v2158_v27 }
 0x1df   : > { %1369 = vmatmul.bf16.gmra.mxu0 %v2783_v31 }
 0x1e0   : > { %v1047_v32 = vpop.f32.mrf.mxu2  ;;  %1269 = vmatpush.bf16.msrb.mxu3 %v2159_v30 }
 0x1e1   : > { %v1048_v39 = vadd.f32 %v2751_v49, %v1047_v32 }
 0x1e3   : > { %v1118_v43 = vmax.f32 %v1048_v39, 0.0  ;;  %v2349_v39 = vld [vmem:[%s3133_s9 + $0x68] sm:$0xff] }
 0x1e4   : > { %v887_v37 = vpop.f32.mrf.mxu3  ;;  %1759 = vmatpush.bf16.msrb.mxu2 %v2349_v39 }
 0x1e5   : > { %v888_v44 = vadd.f32 %v2666_v36, %v887_v37 }
 0x1e7   : > { %v931_v53 = vmax.f32 %v888_v44, 0.0 }
 0x1e8   : > { %v1049_v41 = vpop.f32.mrf.mxu2 }
 0x1e9   : > { %v1050_v42 = vadd.f32 %v2751_v49, %v1049_v41 }
 0x1eb   : > { %v1119_v45 = vmax.f32 %v1050_v42, 0.0  ;;  %v2348_v42 = vld [vmem:[%s3133_s9 + $0x60] sm:$0xff] }
 0x1ec   : > { %v889_v48 = vpop.f32.mrf.mxu3  ;;  %1760 = vmatpush.bf16.msrb.mxu2 %v2348_v42 }
 0x1ed   : > { %v890_v51 = vadd.f32 %v2666_v36, %v889_v48  ;;  %v2808_v52 = vpack.c.bf16 %v1119_v45, %v1118_v43 }
 0x1ef   : > { %v932_v54 = vmax.f32 %v890_v51, 0.0  ;;  %1374 = vmatmul.bf16.gmra.mxu0 %v2808_v52 }
 0x1f0   : > { %v1052_v55 = vpop.f32.mrf.mxu2  ;;  %1761 = vmatpush.bf16.msrb.mxu2 %v2347_v46 }
 0x1f1   : > { %v951_v56 = vpack.c.bf16 %v932_v54, %v931_v53  ;;  %v1053_v62 = vadd.f32 %v2751_v49, %v1052_v55  ;;  %v2346_v55 = vld [vmem:[%s3133_s9 + $0x50] sm:$0xff] }
 0x1f3   : > { %1091 = vmatmul.bf16.vlgmr.msra.gmra.mxu3 %v951_v56  ;;  %v1120_v1 = vmax.f32 %v1053_v62, 0.0 }
 0x1f4   : > { %v892_v59 = vpop.f32.mrf.mxu3  ;;  %1762 = vmatpush.bf16.msrb.mxu2 %v2346_v55 }
 0x1f5   : > { %v893_v2 = vadd.f32 %v2666_v36, %v892_v59 }
 0x1f7   : > { %v933_v12 = vmax.f32 %v893_v2, 0.0 }
 0x1f8   : > { %v1054_v63 = vpop.f32.mrf.mxu2  ;;  %1763 = vmatpush.bf16.msrb.mxu2 %v2345_v60 }
 0x1f9   : > { %v1055_v0 = vadd.f32 %v2751_v49, %v1054_v63 }
 0x1fb   : > { %v1121_v3 = vmax.f32 %v1055_v0, 0.0 }
 0x1fc   : > { %v894_v7 = vpop.f32.mrf.mxu3 }
 0x1fd   : > { %v895_v9 = vadd.f32 %v2666_v36, %v894_v7  ;;  %v2830_v10 = vpack.c.bf16 %v1121_v3, %v1120_v1 }
 0x1ff   : > { %v934_v13 = vmax.f32 %v895_v9, 0.0  ;;  %1379 = vmatmul.bf16.gmra.mxu0 %v2830_v10 }
 0x200   : > { %v1057_v15 = vpop.f32.mrf.mxu2 }
 0x201   : > { %v952_v16 = vpack.c.bf16 %v934_v13, %v933_v12  ;;  %v1058_v21 = vadd.f32 %v2751_v49, %v1057_v15  ;;  %v2897_v13 = vld [vmem:[%s3132_s8] sm:$0x3] }
 0x203   : > { %1096 = vmatmul.bf16.gmra.mxu3 %v952_v16  ;;  %v1122_v24 = vmax.f32 %v1058_v21, 0.0  ;;  %v2902_v16 = vperm.slane %v2897_v13, 1 }
 0x204   : > { %v897_v20 = vpop.f32.mrf.mxu3 }
 0x205   : > { %v898_v25 = vadd.f32 %v2666_v36, %v897_v20 }
 0x207   : > { %v935_v34 = vmax.f32 %v898_v25, 0.0 }
 0x208   : > { %v1059_v22 = vpop.f32.mrf.mxu2 }
 0x209   : > { %v1060_v23 = vadd.f32 %v2751_v49, %v1059_v22 }
 0x20b   : > { %v1123_v26 = vmax.f32 %v1060_v23, 0.0  ;;  %v2339_v23 = vld [vmem:[%s3133_s9 + $0x18] sm:$0xff] }
 0x20c   : > { %v899_v29 = vpop.f32.mrf.mxu3  ;;  %1672 = vmatpush.bf16.msrb.mxu1 %v2339_v23 }
 0x20d   : > { %v900_v32 = vadd.f32 %v2666_v36, %v899_v29  ;;  %v2852_v33 = vpack.c.bf16 %v1123_v26, %v1122_v24 }
 0x20f   : > { %v936_v35 = vmax.f32 %v900_v32, 0.0  ;;  %1384 = vmatmul.bf16.gmra.mxu0 %v2852_v33 }
 0x210   : > { %v1062_v37 = vpop.f32.mrf.mxu2 }
 0x211   : > { %v953_v38 = vpack.c.bf16 %v936_v35, %v935_v34  ;;  %v1063_v43 = vadd.f32 %v2751_v49, %v1062_v37 }
 0x213   : > { %1101 = vmatmul.bf16.gmra.mxu3 %v953_v38  ;;  %v1124_v47 = vmax.f32 %v1063_v43, 0.0 }
 0x214   : > { %v902_v41 = vpop.f32.mrf.mxu3 }
 0x215   : > { %v903_v48 = vadd.f32 %v2666_v36, %v902_v41 }
 0x217   : > { %v937_v56 = vmax.f32 %v903_v48, 0.0 }
 0x218   : > { %v1064_v44 = vpop.f32.mrf.mxu2 }
 0x219   : > { %v1065_v45 = vadd.f32 %v2751_v49, %v1064_v44 }
 0x21b   : > { %v1125_v50 = vmax.f32 %v1065_v45, 0.0 }
 0x21c   : > { %v904_v51 = vpop.f32.mrf.mxu3 }
 0x21d   : > { %v905_v53 = vadd.f32 %v2666_v36, %v904_v51  ;;  %v2871_v54 = vpack.c.bf16 %v1125_v50, %v1124_v47  ;;  %v2344_v36 = vld [vmem:[%s3133_s9 + $0x40] sm:$0xff] }
 0x21e   : > { %1764 = vmatpush.bf16.msrb.mxu2 %v2344_v36 }
 0x21f   : > { %v938_v57 = vmax.f32 %v905_v53, 0.0  ;;  %1389 = vmatmul.bf16.gmra.mxu0 %v2871_v54 }
 0x220   : > { %v1067_v58 = vpop.f32.mrf.mxu2 }
 0x221   : > { %v954_v59 = vpack.c.bf16 %v938_v57, %v937_v56  ;;  %v1068_v62 = vadd.f32 %v2751_v49, %v1067_v58 }
 0x223   : > { %1106 = vmatmul.bf16.gmra.mxu3 %v954_v59  ;;  %v1126_v1 = vmax.f32 %v1068_v62, 0.0 }
 0x228   : > { %v1069_v63 = vpop.f32.mrf.mxu2 }
 0x229   : > { %v1070_v0 = vadd.f32 %v2751_v49, %v1069_v63 }
 0x22b   : > { %v1127_v2 = vmax.f32 %v1070_v0, 0.0 }
 0x22d   : > { %v2885_v3 = vpack.c.bf16 %v1127_v2, %v1126_v1 }
 0x22f   : > { %1394 = vmatmul.bf16.gmra.mxu0 %v2885_v3 }
 0x230   : > { %v1072_v5 = vpop.f32.mrf.mxu2 }
 0x231   : > { %v1073_v6 = vadd.f32 %v2751_v49, %v1072_v5 }
 0x233   : > { %1270 = vmatmul.bf16.vlgmr.msrb.gmra.mxu3 %v2757_v61  ;;  %v1128_v9 = vmax.f32 %v1073_v6, 0.0 }
 0x238   : > { %v1074_v7 = vpop.f32.mrf.mxu2 }
 0x239   : > { %v1075_v8 = vadd.f32 %v2751_v49, %v1074_v7  ;;  %v2337_v7 = vld [vmem:[%s3133_s9 + $0x8] sm:$0xff] }
 0x23b   : > { %v1129_v12 = vmax.f32 %v1075_v8, 0.0 }
 0x23c   : > { %v1360_v14 = vpop.f32.mrf.mxu0 }
 0x23d   : > { %v2899_v15 = vpack.c.bf16 %v1129_v12, %v1128_v9  ;;  %v1361_v17 = vadd.f32 %v1360_v14, %v2902_v16 }
 0x23f   : > { %1399 = vmatmul.bf16.gmra.mxu0 %v2899_v15  ;;  %v1441_v19 = vmax.f32 %v1361_v17, 0.0 }
 0x240   : > { %v1077_v61 = vpop.f32.mrf.mxu2 }
 0x241   : > { %v1078_v21 = vadd.f32 %v2751_v49, %v1077_v61 }
 0x243   : > { %1275 = vmatmul.bf16.gmra.mxu3 %v2764_v11  ;;  %v1130_v27 = vmax.f32 %v1078_v21, 0.0 }
 0x244   : > { %v1362_v18 = vpop.f32.mrf.mxu0 }
 0x245   : > { %v1363_v20 = vadd.f32 %v1362_v18, %v2902_v16 }
 0x247   : > { %v1443_v22 = vmax.f32 %v1363_v20, 0.0 }
 0x248   : > { %v1079_v24 = vpop.f32.mrf.mxu2 }
 0x249   : > { %v1505_v25 = vpack.c.bf16 %v1443_v22, %v1441_v19  ;;  %v1080_v26 = vadd.f32 %v2751_v49, %v1079_v24 }
 0x24b   : > { %v1131_v28 = vmax.f32 %v1080_v26, 0.0  ;;  %1765 = vmatmul.bf16.vlgmr.msrb.gmra.mxu2 %v1505_v25 }
 0x24c   : > { %v1365_v11 = vpop.f32.mrf.mxu0 }
 0x24d   : > { %v2913_v29 = vpack.c.bf16 %v1131_v28, %v1130_v27  ;;  %v1366_v32 = vadd.f32 %v1365_v11, %v2902_v16 }
 0x24f   : > { %1404 = vmatmul.bf16.gmra.mxu0 %v2913_v29  ;;  %v1445_v37 = vmax.f32 %v1366_v32, 0.0 }
 0x250   : > { %v1082_v30 = vpop.f32.mrf.mxu2 }
 0x251   : > { %v1083_v38 = vadd.f32 %v2751_v49, %v1082_v30 }
 0x253   : > { %1280 = vmatmul.bf16.gmra.mxu3 %v2783_v31  ;;  %v1132_v43 = vmax.f32 %v1083_v38, 0.0  ;;  %v2338_v31 = vld [vmem:[%s3133_s9 + $0x10] sm:$0xff] }
 0x254   : > { %v1367_v34 = vpop.f32.mrf.mxu0  ;;  %1673 = vmatpush.bf16.msrb.mxu1 %v2338_v31 }
 0x255   : > { %v1368_v35 = vadd.f32 %v1367_v34, %v2902_v16 }
 0x257   : > { %v1447_v39 = vmax.f32 %v1368_v35, 0.0 }
 0x258   : > { %v1084_v40 = vpop.f32.mrf.mxu2  ;;  %1674 = vmatpush.bf16.msrb.mxu1 %v2337_v7 }
 0x259   : > { %v1085_v41 = vadd.f32 %v2751_v49, %v1084_v40  ;;  %v1507_v42 = vpack.c.bf16 %v1447_v39, %v1445_v37 }
 0x25b   : > { %v1133_v44 = vmax.f32 %v1085_v41, 0.0  ;;  %1770 = vmatmul.bf16.gmra.mxu2 %v1507_v42 }
 0x25c   : > { %v1370_v45 = vpop.f32.mrf.mxu0 }
 0x25d   : > { %v2921_v46 = vpack.c.bf16 %v1133_v44, %v1132_v43  ;;  %v1371_v48 = vadd.f32 %v1370_v45, %v2902_v16 }
 0x25f   : > { %1409 = vmatmul.bf16.gmra.mxu0 %v2921_v46  ;;  %v1449_v53 = vmax.f32 %v1371_v48, 0.0 }
 0x260   : > { %v1087_v47 = vpop.f32.mrf.mxu2 }
 0x261   : > { %v1088_v55 = vadd.f32 %v2751_v49, %v1087_v47 }
 0x263   : > { %1285 = vmatmul.bf16.gmra.mxu3 %v2808_v52  ;;  %v1134_v60 = vmax.f32 %v1088_v55, 0.0 }
 0x264   : > { %v1372_v50 = vpop.f32.mrf.mxu0 }
 0x265   : > { %v1373_v51 = vadd.f32 %v1372_v50, %v2902_v16 }
 0x267   : > { %v1451_v56 = vmax.f32 %v1373_v51, 0.0 }
 0x268   : > { %v1089_v57 = vpop.f32.mrf.mxu2 }
 0x269   : > { %v1090_v58 = vadd.f32 %v2751_v49, %v1089_v57  ;;  %v1509_v59 = vpack.c.bf16 %v1451_v56, %v1449_v53 }
 0x26b   : > { %v1135_v36 = vmax.f32 %v1090_v58, 0.0  ;;  %1775 = vmatmul.bf16.gmra.mxu2 %v1509_v59 }
 0x26c   : > { %v1375_v62 = vpop.f32.mrf.mxu0 }
 0x26d   : > { %v2932_v63 = vpack.c.bf16 %v1135_v36, %v1134_v60  ;;  %v1376_v52 = vadd.f32 %v1375_v62, %v2902_v16 }
 0x26f   : > { %1414 = vmatmul.bf16.gmra.mxu0 %v2932_v63  ;;  %v1453_v4 = vmax.f32 %v1376_v52, 0.0 }
 0x273   : > { %1290 = vmatmul.bf16.gmra.mxu3 %v2830_v10 }
 0x274   : > { %v1377_v0 = vpop.f32.mrf.mxu0 }
 0x275   : > { %v1378_v1 = vadd.f32 %v1377_v0, %v2902_v16 }
 0x276   : > { %v1092_v2 = vpop.f32.mrf.mxu3 }
 0x277   : > { %v1455_v5 = vmax.f32 %v1378_v1, 0.0  ;;  %v1093_v9 = vadd.f32 %v2751_v49, %v1092_v2 }
 0x279   : > { %v1511_v6 = vpack.c.bf16 %v1455_v5, %v1453_v4  ;;  %v1136_v10 = vmax.f32 %v1093_v9, 0.0 }
 0x27b   : > { %1780 = vmatmul.bf16.gmra.mxu2 %v1511_v6 }
 0x27c   : > { %v1380_v8 = vpop.f32.mrf.mxu0 }
 0x27d   : > { %v1381_v17 = vadd.f32 %v1380_v8, %v2902_v16  ;;  %v2977_v8 = vperm.slane %v2897_v13, 0 }
 0x27e   : > { %v1094_v12 = vpop.f32.mrf.mxu3 }
 0x27f   : > { %v1095_v14 = vadd.f32 %v2751_v49, %v1094_v12  ;;  %v1457_v22 = vmax.f32 %v1381_v17, 0.0 }
 0x281   : > { %v1137_v61 = vmax.f32 %v1095_v14, 0.0 }
 0x283   : > { %1295 = vmatmul.bf16.gmra.mxu3 %v2852_v33  ;;  %v2945_v18 = vpack.c.bf16 %v1137_v61, %v1136_v10  ;;  %v2336_v33 = vld [vmem:[%s3133_s9] sm:$0xff] }
 0x284   : > { %v1382_v20 = vpop.f32.mrf.mxu0  ;;  %1675 = vmatpush.bf16.msrb.mxu1 %v2336_v33 }
 0x285   : > { %v1383_v19 = vadd.f32 %v1382_v20, %v2902_v16  ;;  %1419 = vmatmul.bf16.gmra.mxu0 %v2945_v18 }
 0x286   : > { %v1097_v21 = vpop.f32.mrf.mxu3 }
 0x287   : > { %v1459_v23 = vmax.f32 %v1383_v19, 0.0  ;;  %v1098_v26 = vadd.f32 %v2751_v49, %v1097_v21 }
 0x289   : > { %v1513_v24 = vpack.c.bf16 %v1459_v23, %v1457_v22  ;;  %v1138_v11 = vmax.f32 %v1098_v26, 0.0 }
 0x28b   : > { %1785 = vmatmul.bf16.gmra.mxu2 %v1513_v24 }
 0x28c   : > { %v1385_v25 = vpop.f32.mrf.mxu0 }
 0x28d   : > { %v1386_v32 = vadd.f32 %v1385_v25, %v2902_v16 }
 0x28e   : > { %v1099_v27 = vpop.f32.mrf.mxu3 }
 0x28f   : > { %v1100_v28 = vadd.f32 %v2751_v49, %v1099_v27  ;;  %v1461_v39 = vmax.f32 %v1386_v32, 0.0 }
 0x291   : > { %v1139_v30 = vmax.f32 %v1100_v28, 0.0 }
 0x293   : > { %1300 = vmatmul.bf16.gmra.mxu3 %v2871_v54  ;;  %v2956_v34 = vpack.c.bf16 %v1139_v30, %v1138_v11 }
 0x294   : > { %v1387_v35 = vpop.f32.mrf.mxu0 }
 0x295   : > { %v1388_v37 = vadd.f32 %v1387_v35, %v2902_v16  ;;  %1424 = vmatmul.bf16.gmra.mxu0 %v2956_v34 }
 0x296   : > { %v1102_v38 = vpop.f32.mrf.mxu3 }
 0x297   : > { %v1463_v40 = vmax.f32 %v1388_v37, 0.0  ;;  %v1103_v43 = vadd.f32 %v2751_v49, %v1102_v38 }
 0x299   : > { %v1515_v41 = vpack.c.bf16 %v1463_v40, %v1461_v39  ;;  %v1140_v31 = vmax.f32 %v1103_v43, 0.0 }
 0x29b   : > { %1790 = vmatmul.bf16.gmra.mxu2 %v1515_v41 }
 0x29c   : > { %v1390_v42 = vpop.f32.mrf.mxu0 }
 0x29d   : > { %v1391_v47 = vadd.f32 %v1390_v42, %v2902_v16 }
 0x29e   : > { %v1104_v44 = vpop.f32.mrf.mxu3 }
 0x29f   : > { %v1105_v45 = vadd.f32 %v2751_v49, %v1104_v44  ;;  %v1465_v55 = vmax.f32 %v1391_v47, 0.0 }
 0x2a1   : > { %v1141_v54 = vmax.f32 %v1105_v45, 0.0 }
 0x2a3   : > { %1305 = vmatmul.bf16.gmra.mxu3 %v2885_v3  ;;  %v2964_v48 = vpack.c.bf16 %v1141_v54, %v1140_v31 }
 0x2a4   : > { %v1392_v50 = vpop.f32.mrf.mxu0 }
 0x2a5   : > { %v1393_v51 = vadd.f32 %v1392_v50, %v2902_v16  ;;  %1429 = vmatmul.bf16.gmra.mxu0 %v2964_v48 }
 0x2a6   : > { %v1107_v53 = vpop.f32.mrf.mxu3 }
 0x2a7   : > { %v1467_v56 = vmax.f32 %v1393_v51, 0.0  ;;  %v1108_v59 = vadd.f32 %v2751_v49, %v1107_v53 }
 0x2a9   : > { %v1517_v57 = vpack.c.bf16 %v1467_v56, %v1465_v55  ;;  %v1142_v62 = vmax.f32 %v1108_v59, 0.0 }
 0x2ab   : > { %1795 = vmatmul.bf16.gmra.mxu2 %v1517_v57 }
 0x2ac   : > { %v1395_v58 = vpop.f32.mrf.mxu0 }
 0x2ad   : > { %v1396_v52 = vadd.f32 %v1395_v58, %v2902_v16 }
 0x2ae   : > { %v1109_v60 = vpop.f32.mrf.mxu3 }
 0x2af   : > { %v1110_v36 = vadd.f32 %v2751_v49, %v1109_v60  ;;  %v1469_v5 = vmax.f32 %v1396_v52, 0.0 }
 0x2b1   : > { %v1143_v3 = vmax.f32 %v1110_v36, 0.0 }
 0x2b3   : > { %1310 = vmatmul.bf16.gmra.mxu3 %v2899_v15  ;;  %v2972_v0 = vpack.c.bf16 %v1143_v3, %v1142_v62 }
 0x2b4   : > { %v1397_v1 = vpop.f32.mrf.mxu0 }
 0x2b5   : > { %v1398_v2 = vadd.f32 %v1397_v1, %v2902_v16  ;;  %1434 = vmatmul.bf16.gmra.mxu0 %v2972_v0 }
 0x2b6   : > { %v1271_v4 = vpop.f32.mrf.mxu3 }
 0x2b7   : > { %v1471_v6 = vmax.f32 %v1398_v2, 0.0  ;;  %v1272_v9 = vadd.f32 %v1271_v4, %v2977_v8 }
 0x2b9   : > { %v1519_v7 = vpack.c.bf16 %v1471_v6, %v1469_v5  ;;  %v1440_v14 = vmax.f32 %v1272_v9, 0.0 }
 0x2bb   : > { %1800 = vmatmul.bf16.gmra.mxu2 %v1519_v7 }
 0x2bc   : > { %v1400_v49 = vpop.f32.mrf.mxu0 }
 0x2bd   : > { %v1401_v61 = vadd.f32 %v1400_v49, %v2902_v16 }
 0x2be   : > { %v1273_v12 = vpop.f32.mrf.mxu3 }
 0x2bf   : > { %v1274_v15 = vadd.f32 %v1273_v12, %v2977_v8  ;;  %v1473_v21 = vmax.f32 %v1401_v61, 0.0 }
 0x2c1   : > { %v1442_v10 = vmax.f32 %v1274_v15, 0.0 }
 0x2c3   : > { %v1504_v17 = vpack.c.bf16 %v1442_v10, %v1440_v14  ;;  %1315 = vmatmul.bf16.gmra.mxu3 %v2913_v29 }
 0x2c4   : > { %v1402_v20 = vpop.f32.mrf.mxu0 }
 0x2c5   : > { %v1403_v19 = vadd.f32 %v1402_v20, %v2902_v16  ;;  %1676 = vmatmul.bf16.vlgmr.msrb.gmra.mxu1 %v1504_v17 }
 0x2c6   : > { %v1276_v13 = vpop.f32.mrf.mxu3 }
 0x2c7   : > { %v1475_v22 = vmax.f32 %v1403_v19, 0.0  ;;  %v1277_v25 = vadd.f32 %v1276_v13, %v2977_v8 }
 0x2c9   : > { %v1521_v23 = vpack.c.bf16 %v1475_v22, %v1473_v21  ;;  %v1444_v28 = vmax.f32 %v1277_v25, 0.0 }
 0x2cb   : > { %1805 = vmatmul.bf16.gmra.mxu2 %v1521_v23 }
 0x2cc   : > { %v1405_v24 = vpop.f32.mrf.mxu0 }
 0x2cd   : > { %v1406_v11 = vadd.f32 %v1405_v24, %v2902_v16 }
 0x2ce   : > { %v1278_v26 = vpop.f32.mrf.mxu3  ;;  %v2999_v6 = vpop.f32.mrf.mxu2 }
 0x2cf   : > { %v1279_v27 = vadd.f32 %v1278_v26, %v2977_v8  ;;  %v1477_v37 = vmax.f32 %v1406_v11, 0.0 }
 0x2d1   : > { %v1446_v33 = vmax.f32 %v1279_v27, 0.0 }
 0x2d3   : > { %1320 = vmatmul.bf16.gmra.mxu3 %v2921_v46  ;;  %v1506_v29 = vpack.c.bf16 %v1446_v33, %v1444_v28 }
 0x2d4   : > { %v1407_v30 = vpop.f32.mrf.mxu0 }
 0x2d5   : > { %v1408_v32 = vadd.f32 %v1407_v30, %v2902_v16  ;;  %1681 = vmatmul.bf16.gmra.mxu1 %v1506_v29 }
 0x2d6   : > { %v1281_v35 = vpop.f32.mrf.mxu3  ;;  %v3004_v10 = vpop.f32.mrf.mxu2 }
 0x2d7   : > { %v1479_v38 = vmax.f32 %v1408_v32, 0.0  ;;  %v1282_v41 = vadd.f32 %v1281_v35, %v2977_v8 }
 0x2d9   : > { %v1523_v39 = vpack.c.bf16 %v1479_v38, %v1477_v37  ;;  %v1448_v44 = vmax.f32 %v1282_v41, 0.0 }
 0x2db   : > { %1810 = vmatmul.bf16.gmra.mxu2 %v1523_v39 }
 0x2dc   : > { %v1410_v40 = vpop.f32.mrf.mxu0 }
 0x2dd   : > { %v1411_v46 = vadd.f32 %v1410_v40, %v2902_v16 }
 0x2de   : > { %v1283_v42 = vpop.f32.mrf.mxu3  ;;  %v3009_v24 = vpop.f32.mrf.mxu2 }
 0x2df   : > { %v1284_v43 = vadd.f32 %v1283_v42, %v2977_v8  ;;  %v1481_v51 = vmax.f32 %v1411_v46, 0.0 }
 0x2e1   : > { %v1450_v45 = vmax.f32 %v1284_v43, 0.0 }
 0x2e3   : > { %1325 = vmatmul.bf16.gmra.mxu3 %v2932_v63  ;;  %v1508_v31 = vpack.c.bf16 %v1450_v45, %v1448_v44 }
 0x2e4   : > { %v1412_v54 = vpop.f32.mrf.mxu0 }
 0x2e5   : > { %v1413_v47 = vadd.f32 %v1412_v54, %v2902_v16  ;;  %1686 = vmatmul.bf16.gmra.mxu1 %v1508_v31 }
 0x2e6   : > { %v1286_v50 = vpop.f32.mrf.mxu3  ;;  %v3013_v29 = vpop.f32.mrf.mxu2 }
 0x2e7   : > { %v1483_v53 = vmax.f32 %v1413_v47, 0.0  ;;  %v1287_v57 = vadd.f32 %v1286_v50, %v2977_v8 }
 0x2e9   : > { %v1525_v55 = vpack.c.bf16 %v1483_v53, %v1481_v51  ;;  %v1452_v60 = vmax.f32 %v1287_v57, 0.0 }
 0x2eb   : > { %1815 = vmatmul.bf16.gmra.mxu2 %v1525_v55 }
 0x2ec   : > { %v1415_v56 = vpop.f32.mrf.mxu0 }
 0x2ed   : > { %v1416_v63 = vadd.f32 %v1415_v56, %v2902_v16 }
 0x2ee   : > { %v1288_v58 = vpop.f32.mrf.mxu3  ;;  %v3019_v45 = vpop.f32.mrf.mxu2 }
 0x2ef   : > { %v1289_v59 = vadd.f32 %v1288_v58, %v2977_v8  ;;  %v1485_v2 = vmax.f32 %v1416_v63, 0.0 }
 0x2f1   : > { %v1454_v36 = vmax.f32 %v1289_v59, 0.0 }
 0x2f3   : > { %1330 = vmatmul.bf16.gmra.mxu3 %v2945_v18  ;;  %v1510_v62 = vpack.c.bf16 %v1454_v36, %v1452_v60 }
 0x2f4   : > { %v1417_v3 = vpop.f32.mrf.mxu0 }
 0x2f5   : > { %v1418_v52 = vadd.f32 %v1417_v3, %v2902_v16  ;;  %1691 = vmatmul.bf16.gmra.mxu1 %v1510_v62 }
 0x2f6   : > { %v1291_v1 = vpop.f32.mrf.mxu3  ;;  %v3024_v51 = vpop.f32.mrf.mxu2 }
 0x2f7   : > { %v1487_v4 = vmax.f32 %v1418_v52, 0.0  ;;  %v1292_v7 = vadd.f32 %v1291_v1, %v2977_v8 }
 0x2f9   : > { %v1527_v5 = vpack.c.bf16 %v1487_v4, %v1485_v2  ;;  %v1456_v12 = vmax.f32 %v1292_v7, 0.0 }
 0x2fb   : > { %1820 = vmatmul.bf16.gmra.mxu2 %v1527_v5 }
 0x2fe   : > { %v1293_v49 = vpop.f32.mrf.mxu3  ;;  %v3028_v3 = vpop.f32.mrf.mxu2 }
 0x2ff   : > { %v1294_v9 = vadd.f32 %v1293_v49, %v2977_v8 }
 0x301   : > { %v1458_v15 = vmax.f32 %v1294_v9, 0.0 }
 0x302   : > { %v1420_v18 = vpop.f32.mrf.mxu0 }
 0x303   : > { %v1512_v14 = vpack.c.bf16 %v1458_v15, %v1456_v12  ;;  %1335 = vmatmul.bf16.gmra.mxu3 %v2956_v34  ;;  %v1421_v17 = vadd.f32 %v1420_v18, %v2902_v16 }
 0x305   : > { %1696 = vmatmul.bf16.gmra.mxu1 %v1512_v14  ;;  %v1489_v13 = vmax.f32 %v1421_v17, 0.0 }
 0x306   : > { %v1296_v61 = vpop.f32.mrf.mxu3  ;;  %v3034_v15 = vpop.f32.mrf.mxu2 }
 0x307   : > { %v1297_v21 = vadd.f32 %v1296_v61, %v2977_v8 }
 0x309   : > { %v1460_v34 = vmax.f32 %v1297_v21, 0.0 }
 0x30a   : > { %v1422_v20 = vpop.f32.mrf.mxu0 }
 0x30b   : > { %v1423_v19 = vadd.f32 %v1422_v20, %v2902_v16 }
 0x30d   : > { %v1491_v22 = vmax.f32 %v1423_v19, 0.0 }
 0x30e   : > { %v1298_v23 = vpop.f32.mrf.mxu3 }
 0x30f   : > { %v1529_v25 = vpack.c.bf16 %v1491_v22, %v1489_v13  ;;  %v1299_v26 = vadd.f32 %v1298_v23, %v2977_v8 }
 0x311   : > { %v1462_v27 = vmax.f32 %v1299_v26, 0.0  ;;  %1825 = vmatmul.bf16.gmra.mxu2 %v1529_v25 }
 0x312   : > { %v1425_v28 = vpop.f32.mrf.mxu0 }
 0x313   : > { %v1514_v33 = vpack.c.bf16 %v1462_v27, %v1460_v34  ;;  %1340 = vmatmul.bf16.gmra.mxu3 %v2964_v48  ;;  %v1426_v30 = vadd.f32 %v1425_v28, %v2902_v16  ;;  %v3038_v27 = vpop.f32.mrf.mxu2 }
 0x315   : > { %1701 = vmatmul.bf16.gmra.mxu1 %v1514_v33  ;;  %v1493_v37 = vmax.f32 %v1426_v30, 0.0  ;;  %v3043_v33 = vld [vmem:[%s3134_s10] ss:$0 sm:$0xff] }
 0x316   : > { %v1301_v11 = vpop.f32.mrf.mxu3 }
 0x317   : > { %v1302_v38 = vadd.f32 %v1301_v11, %v2977_v8 }
 0x319   : > { %v1464_v43 = vmax.f32 %v1302_v38, 0.0 }
 0x31a   : > { %v1427_v32 = vpop.f32.mrf.mxu0 }
 0x31b   : > { %v1428_v35 = vadd.f32 %v1427_v32, %v2902_v16 }
 0x31d   : > { %v1495_v39 = vmax.f32 %v1428_v35, 0.0 }
 0x31e   : > { %v1303_v40 = vpop.f32.mrf.mxu3 }
 0x31f   : > { %v1531_v41 = vpack.c.bf16 %v1495_v39, %v1493_v37  ;;  %v1304_v42 = vadd.f32 %v1303_v40, %v2977_v8  ;;  %v3048_v39 = vpop.f32.mrf.mxu2 }
 0x321   : > { %v1466_v44 = vmax.f32 %v1304_v42, 0.0  ;;  %1830 = vmatmul.bf16.gmra.mxu2 %v1531_v41 }
 0x322   : > { %v1430_v48 = vpop.f32.mrf.mxu0 }
 0x323   : > { %v1516_v46 = vpack.c.bf16 %v1466_v44, %v1464_v43  ;;  %1345 = vmatmul.bf16.gmra.mxu3 %v2972_v0  ;;  %v1431_v54 = vadd.f32 %v1430_v48, %v2902_v16 }
 0x325   : > { %1706 = vmatmul.bf16.gmra.mxu1 %v1516_v46  ;;  %v1497_v53 = vmax.f32 %v1431_v54, 0.0 }
 0x326   : > { %v1306_v31 = vpop.f32.mrf.mxu3 }
 0x327   : > { %v1307_v55 = vadd.f32 %v1306_v31, %v2977_v8 }
 0x329   : > { %v1468_v60 = vmax.f32 %v1307_v55, 0.0 }
 0x32a   : > { %v1432_v47 = vpop.f32.mrf.mxu0 }
 0x32b   : > { %v1433_v50 = vadd.f32 %v1432_v47, %v2902_v16 }
 0x32d   : > { %v1499_v56 = vmax.f32 %v1433_v50, 0.0 }
 0x32e   : > { %v1308_v57 = vpop.f32.mrf.mxu3 }
 0x32f   : > { %v1533_v58 = vpack.c.bf16 %v1499_v56, %v1497_v53  ;;  %v1309_v59 = vadd.f32 %v1308_v57, %v2977_v8  ;;  %v1791_v56 = vpop.f32.mrf.mxu2 }
 0x331   : > { %v1470_v36 = vmax.f32 %v1309_v59, 0.0  ;;  %1835 = vmatmul.bf16.gmra.mxu2 %v1533_v58 }
 0x332   : > { %v1435_v0 = vpop.f32.mrf.mxu0 }
 0x333   : > { %v1518_v63 = vpack.c.bf16 %v1470_v36, %v1468_v60  ;;  %v1436_v52 = vadd.f32 %v1435_v0, %v2902_v16 }
 0x335   : > { %1711 = vmatmul.bf16.gmra.mxu1 %v1518_v63  ;;  %v1501_v4 = vmax.f32 %v1436_v52, 0.0 }
 0x336   : > { %v1311_v62 = vpop.f32.mrf.mxu3 }
 0x337   : > { %v1312_v5 = vadd.f32 %v1311_v62, %v2977_v8 }
 0x339   : > { %v1472_v18 = vmax.f32 %v1312_v5, 0.0 }
 0x33a   : > { %v1437_v1 = vpop.f32.mrf.mxu0 }
 0x33b   : > { %v1438_v2 = vadd.f32 %v1437_v1, %v2902_v16 }
 0x33d   : > { %v1503_v7 = vmax.f32 %v1438_v2, 0.0 }
 0x33e   : > { %v1313_v49 = vpop.f32.mrf.mxu3 }
 0x33f   : > { %v1535_v9 = vpack.c.bf16 %v1503_v7, %v1501_v4  ;;  %v1314_v12 = vadd.f32 %v1313_v49, %v2977_v8 }
 0x341   : > { %v1474_v14 = vmax.f32 %v1314_v12, 0.0  ;;  %1840 = vmatmul.bf16.gmra.mxu2 %v1535_v9 }
 0x342   : > { %v1677_v61 = vpop.f32.mrf.mxu1 }
 0x343   : > { %v1520_v17 = vpack.c.bf16 %v1474_v14, %v1472_v18  ;;  %v1678_v32 = vadd.f32 %v3043_v33, %v1677_v61 }
 0x345   : > { %1716 = vmatmul.bf16.gmra.mxu1 %v1520_v17  ;;  %v1767_v41 = vadd.f32 %v2999_v6, %v1678_v32 }
 0x346   : > { %v1316_v20 = vpop.f32.mrf.mxu3 }
 0x347   : > { %v1317_v16 = vadd.f32 %v1316_v20, %v2977_v8  ;;  %v1846_v46 = vmax.f32 %v1767_v41, 0.0 }
 0x349   : > { %v1476_v22 = vmax.f32 %v1317_v16, 0.0 }
 0x34a   : > { %v1679_v19 = vpop.f32.mrf.mxu1 }
 0x34b   : > { %v1680_v31 = vadd.f32 %v3043_v33, %v1679_v19 }
 0x34d   : > { %v1769_v53 = vadd.f32 %v3004_v10, %v1680_v31 }
 0x34e   : > { %v1318_v13 = vpop.f32.mrf.mxu3 }
 0x34f   : > { %v1319_v21 = vadd.f32 %v1318_v13, %v2977_v8  ;;  %v1847_v59 = vmax.f32 %v1769_v53, 0.0 }
 0x351   : > { %v1478_v23 = vmax.f32 %v1319_v21, 0.0 }
 0x352   : > { %v1682_v25 = vpop.f32.mrf.mxu1 }
 0x353   : > { %v1522_v26 = vpack.c.bf16 %v1478_v23, %v1476_v22 }
 0x355   : > { %1721 = vmatmul.bf16.gmra.mxu1 %v1522_v26 }
 0x356   : > { %v1321_v34 = vpop.f32.mrf.mxu3 }
 0x357   : > { %v1322_v11 = vadd.f32 %v1321_v34, %v2977_v8 }
 0x359   : > { %v1480_v37 = vmax.f32 %v1322_v11, 0.0 }
 0x35a   : > { %v1684_v28 = vpop.f32.mrf.mxu1 }
 0x35b   : > { %v1685_v49 = vadd.f32 %v3043_v33, %v1684_v28 }
 0x35d   : > { %v1774_v14 = vadd.f32 %v3013_v29, %v1685_v49 }
 0x35e   : > { %v1323_v30 = vpop.f32.mrf.mxu3 }
 0x35f   : > { %v1324_v35 = vadd.f32 %v1323_v30, %v2977_v8  ;;  %v1849_v19 = vmax.f32 %v1774_v14, 0.0 }
 0x361   : > { %v1482_v38 = vmax.f32 %v1324_v35, 0.0 }
 0x362   : > { %v1687_v40 = vpop.f32.mrf.mxu1 }
 0x363   : > { %v1524_v42 = vpack.c.bf16 %v1482_v38, %v1480_v37  ;;  %v1688_v43 = vadd.f32 %v3043_v33, %v1687_v40 }
 0x365   : > { %v1777_v44 = vadd.f32 %v3019_v45, %v1688_v43  ;;  %1726 = vmatmul.bf16.gmra.mxu1 %v1524_v42  ;;  %v1683_v45 = vadd.f32 %v3043_v33, %v1682_v25 }
 0x366   : > { %v1326_v48 = vpop.f32.mrf.mxu3 }
 0x367   : > { %v1850_v54 = vmax.f32 %v1777_v44, 0.0  ;;  %v1327_v6 = vadd.f32 %v1326_v48, %v2977_v8  ;;  %v1772_v10 = vadd.f32 %v3009_v24, %v1683_v45 }
 0x369   : > { %v1878_v47 = vmax.f32 %v1846_v46, %v1850_v54  ;;  %v1484_v0 = vmax.f32 %v1327_v6, 0.0  ;;  %v1848_v7 = vmax.f32 %v1772_v10, 0.0 }
 0x36a   : > { %v1689_v50 = vpop.f32.mrf.mxu1 }
 0x36b   : > { %v1690_v55 = vadd.f32 %v3043_v33, %v1689_v50 }
 0x36d   : > { %v1779_v57 = vadd.f32 %v3024_v51, %v1690_v55  ;;  %v1793_v51 = vpop.f32.mrf.mxu2 }
 0x36e   : > { %v1328_v58 = vpop.f32.mrf.mxu3 }
 0x36f   : > { %v1851_v60 = vmax.f32 %v1779_v57, 0.0  ;;  %v1329_v36 = vadd.f32 %v1328_v58, %v2977_v8 }
 0x371   : > { %v1879_v63 = vmax.f32 %v1847_v59, %v1851_v60  ;;  %v1486_v62 = vmax.f32 %v1329_v36, 0.0 }
 0x372   : > { %v1692_v52 = vpop.f32.mrf.mxu1 }
 0x373   : > { %v1526_v1 = vpack.c.bf16 %v1486_v62, %v1484_v0  ;;  %v1693_v2 = vadd.f32 %v3043_v33, %v1692_v52 }
 0x375   : > { %v1782_v4 = vadd.f32 %v3028_v3, %v1693_v2  ;;  %1731 = vmatmul.bf16.gmra.mxu1 %v1526_v1  ;;  %v1796_v13 = vpop.f32.mrf.mxu2 }
 0x376   : > { %v1331_v5 = vpop.f32.mrf.mxu3 }
 0x377   : > { %v1852_v9 = vmax.f32 %v1782_v4, 0.0  ;;  %v1332_v24 = vadd.f32 %v1331_v5, %v2977_v8 }
 0x379   : > { %v1880_v12 = vmax.f32 %v1848_v7, %v1852_v9  ;;  %v1488_v21 = vmax.f32 %v1332_v24, 0.0 }
 0x37a   : > { %v1694_v18 = vpop.f32.mrf.mxu1 }
 0x37b   : > { %v1695_v61 = vadd.f32 %v3043_v33, %v1694_v18 }
 0x37d   : > { %v1784_v17 = vadd.f32 %v3034_v15, %v1695_v61  ;;  %v1798_v15 = vpop.f32.mrf.mxu2 }
 0x37e   : > { %v1333_v20 = vpop.f32.mrf.mxu3 }
 0x37f   : > { %v1853_v3 = vmax.f32 %v1784_v17, 0.0  ;;  %v1334_v16 = vadd.f32 %v1333_v20, %v2977_v8 }
 0x381   : > { %v1881_v22 = vmax.f32 %v1849_v19, %v1853_v3  ;;  %v1490_v23 = vmax.f32 %v1334_v16, 0.0 }
 0x382   : > { %v1697_v25 = vpop.f32.mrf.mxu1 }
 0x383   : > { %v1528_v26 = vpack.c.bf16 %v1490_v23, %v1488_v21  ;;  %v1698_v34 = vadd.f32 %v3043_v33, %v1697_v25 }
 0x385   : > { %v1787_v29 = vadd.f32 %v3038_v27, %v1698_v34  ;;  %1736 = vmatmul.bf16.gmra.mxu1 %v1528_v26  ;;  %v1801_v54 = vpop.f32.mrf.mxu2 }
 0x386   : > { %v1336_v28 = vpop.f32.mrf.mxu3 }
 0x387   : > { %v1854_v11 = vmax.f32 %v1787_v29, 0.0  ;;  %v1337_v37 = vadd.f32 %v1336_v28, %v2977_v8 }
 0x389   : > { %v1882_v30 = vmax.f32 %v1878_v47, %v1854_v11  ;;  %v1492_v43 = vmax.f32 %v1337_v37, 0.0 }
 0x38a   : > { %v1699_v32 = vpop.f32.mrf.mxu1 }
 0x38b   : > { %v1700_v35 = vadd.f32 %v3043_v33, %v1699_v32 }
 0x38d   : > { %v1789_v38 = vadd.f32 %v3048_v39, %v1700_v35  ;;  %v1803_v59 = vpop.f32.mrf.mxu2 }
 0x38e   : > { %v1338_v40 = vpop.f32.mrf.mxu3 }
 0x38f   : > { %v1855_v41 = vmax.f32 %v1789_v38, 0.0  ;;  %v1339_v42 = vadd.f32 %v1338_v40, %v2977_v8 }
 0x391   : > { %v1883_v44 = vmax.f32 %v1879_v63, %v1855_v41  ;;  %v1494_v48 = vmax.f32 %v1339_v42, 0.0 }
 0x392   : > { %v1702_v27 = vpop.f32.mrf.mxu1 }
 0x393   : > { %v1530_v46 = vpack.c.bf16 %v1494_v48, %v1492_v43  ;;  %v1703_v31 = vadd.f32 %v3043_v33, %v1702_v27 }
 0x395   : > { %v1792_v47 = vadd.f32 %v1791_v56, %v1703_v31  ;;  %1741 = vmatmul.bf16.gmra.mxu1 %v1530_v46  ;;  %v1806_v5 = vpop.f32.mrf.mxu2 }
 0x396   : > { %v1341_v50 = vpop.f32.mrf.mxu3 }
 0x397   : > { %v1856_v53 = vmax.f32 %v1792_v47, 0.0  ;;  %v1342_v57 = vadd.f32 %v1341_v50, %v2977_v8 }
 0x399   : > { %v1884_v55 = vmax.f32 %v1880_v12, %v1856_v53  ;;  %v1496_v0 = vmax.f32 %v1342_v57, 0.0 }
 0x39a   : > { %v1704_v6 = vpop.f32.mrf.mxu1 }
 0x39b   : > { %v1705_v39 = vadd.f32 %v3043_v33, %v1704_v6 }
 0x39d   : > { %v1794_v58 = vadd.f32 %v1793_v51, %v1705_v39  ;;  %v1808_v19 = vpop.f32.mrf.mxu2 }
 0x39e   : > { %v1343_v45 = vpop.f32.mrf.mxu3 }
 0x39f   : > { %v1857_v60 = vmax.f32 %v1794_v58, 0.0  ;;  %v1344_v36 = vadd.f32 %v1343_v45, %v2977_v8 }
 0x3a1   : > { %v1885_v63 = vmax.f32 %v1881_v22, %v1857_v60  ;;  %v1498_v62 = vmax.f32 %v1344_v36, 0.0 }
 0x3a2   : > { %v1707_v52 = vpop.f32.mrf.mxu1 }
 0x3a3   : > { %v1532_v56 = vpack.c.bf16 %v1498_v62, %v1496_v0  ;;  %v1708_v10 = vadd.f32 %v3043_v33, %v1707_v52 }
 0x3a5   : > { %v1797_v1 = vadd.f32 %v1796_v13, %v1708_v10  ;;  %1746 = vmatmul.bf16.gmra.mxu1 %v1532_v56  ;;  %v1811_v34 = vpop.f32.mrf.mxu2 }
 0x3a6   : > { %v1346_v2 = vpop.f32.mrf.mxu3 }
 0x3a7   : > { %v1858_v4 = vmax.f32 %v1797_v1, 0.0  ;;  %v1347_v9 = vadd.f32 %v1346_v2, %v2977_v8 }
 0x3a9   : > { %v1886_v7 = vmax.f32 %v1882_v30, %v1858_v4  ;;  %v1500_v24 = vmax.f32 %v1347_v9, 0.0 }
 0x3aa   : > { %v1709_v49 = vpop.f32.mrf.mxu1 }
 0x3ab   : > { %v1710_v51 = vadd.f32 %v3043_v33, %v1709_v49 }
 0x3ad   : > { %v1799_v12 = vadd.f32 %v1798_v15, %v1710_v51  ;;  %v1813_v32 = vpop.f32.mrf.mxu2 }
 0x3ae   : > { %v1348_v18 = vpop.f32.mrf.mxu3 }
 0x3af   : > { %v1859_v14 = vmax.f32 %v1799_v12, 0.0  ;;  %v1349_v61 = vadd.f32 %v1348_v18, %v2977_v8 }
 0x3b1   : > { %v1887_v17 = vmax.f32 %v1883_v44, %v1859_v14  ;;  %v1502_v20 = vmax.f32 %v1349_v61, 0.0 }
 0x3b2   : > { %v1712_v3 = vpop.f32.mrf.mxu1 }
 0x3b3   : > { %v1534_v16 = vpack.c.bf16 %v1502_v20, %v1500_v24  ;;  %v1713_v13 = vadd.f32 %v3043_v33, %v1712_v3 }
 0x3b5   : > { %v1802_v21 = vadd.f32 %v1801_v54, %v1713_v13  ;;  %1751 = vmatmul.bf16.gmra.mxu1 %v1534_v16  ;;  %v1816_v43 = vpop.f32.mrf.mxu2 }
 0x3b7   : > { %v1860_v22 = vmax.f32 %v1802_v21, 0.0 }
 0x3b9   : > { %v1888_v23 = vmax.f32 %v1884_v55, %v1860_v22 }
 0x3ba   : > { %v1714_v25 = vpop.f32.mrf.mxu1 }
 0x3bb   : > { %v1715_v26 = vadd.f32 %v3043_v33, %v1714_v25 }
 0x3bd   : > { %v1804_v29 = vadd.f32 %v1803_v59, %v1715_v26  ;;  %v1818_v47 = vpop.f32.mrf.mxu2 }
 0x3bf   : > { %v1861_v28 = vmax.f32 %v1804_v29, 0.0 }
 0x3c1   : > { %v1889_v11 = vmax.f32 %v1885_v63, %v1861_v28 }
 0x3c2   : > { %v1717_v8 = vpop.f32.mrf.mxu1 }
 0x3c3   : > { %v1718_v30 = vadd.f32 %v3043_v33, %v1717_v8 }
 0x3c5   : > { %v1807_v15 = vadd.f32 %v1806_v5, %v1718_v30  ;;  %v1821_v59 = vpop.f32.mrf.mxu2 }
 0x3c7   : > { %v1862_v35 = vmax.f32 %v1807_v15, 0.0 }
 0x3c9   : > { %v1890_v37 = vmax.f32 %v1886_v7, %v1862_v35 }
 0x3ca   : > { %v1719_v38 = vpop.f32.mrf.mxu1 }
 0x3cb   : > { %v1720_v40 = vadd.f32 %v3043_v33, %v1719_v38 }
 0x3cd   : > { %v1809_v41 = vadd.f32 %v1808_v19, %v1720_v40  ;;  %v1823_v52 = vpop.f32.mrf.mxu2 }
 0x3cf   : > { %v1863_v42 = vmax.f32 %v1809_v41, 0.0 }
 0x3d1   : > { %v1891_v44 = vmax.f32 %v1887_v17, %v1863_v42 }
 0x3d2   : > { %v1722_v48 = vpop.f32.mrf.mxu1 }
 0x3d3   : > { %v1723_v27 = vadd.f32 %v3043_v33, %v1722_v48 }
 0x3d5   : > { %v1812_v46 = vadd.f32 %v1811_v34, %v1723_v27  ;;  %v1826_v5 = vpop.f32.mrf.mxu2 }
 0x3d7   : > { %v1864_v31 = vmax.f32 %v1812_v46, 0.0 }
 0x3d9   : > { %v1892_v54 = vmax.f32 %v1888_v23, %v1864_v31 }
 0x3da   : > { %v1724_v50 = vpop.f32.mrf.mxu1 }
 0x3db   : > { %v1725_v53 = vadd.f32 %v3043_v33, %v1724_v50 }
 0x3dd   : > { %v1814_v55 = vadd.f32 %v1813_v32, %v1725_v53  ;;  %v1828_v9 = vpop.f32.mrf.mxu2 }
 0x3df   : > { %v1865_v6 = vmax.f32 %v1814_v55, 0.0 }
 0x3e1   : > { %v3089_v39 = vmax.f32 %v1889_v11, %v1865_v6 }
 0x3e2   : > { %v1727_v57 = vpop.f32.mrf.mxu1 }
 0x3e3   : > { %v1728_v58 = vadd.f32 %v3043_v33, %v1727_v57 }
 0x3e5   : > { %v1817_v45 = vadd.f32 %v1816_v43, %v1728_v58  ;;  %v1831_v18 = vpop.f32.mrf.mxu2 }
 0x3e7   : > { %v1866_v60 = vmax.f32 %v1817_v45, 0.0 }
 0x3e9   : > { %v1894_v36 = vmax.f32 %v1890_v37, %v1866_v60 }
 0x3ea   : > { %v1729_v0 = vpop.f32.mrf.mxu1 }
 0x3eb   : > { %v1730_v63 = vadd.f32 %v3043_v33, %v1729_v0 }
 0x3ed   : > { %v1819_v62 = vadd.f32 %v1818_v47, %v1730_v63  ;;  %v1833_v24 = vpop.f32.mrf.mxu2 }
 0x3ef   : > { %v1867_v56 = vmax.f32 %v1819_v62, 0.0 }
 0x3f1   : > { %v1895_v10 = vmax.f32 %v1891_v44, %v1867_v56 }
 0x3f2   : > { %v1732_v1 = vpop.f32.mrf.mxu1 }
 0x3f3   : > { %v1733_v2 = vadd.f32 %v3043_v33, %v1732_v1 }
 0x3f5   : > { %v1822_v4 = vadd.f32 %v1821_v59, %v1733_v2  ;;  %v1836_v20 = vpop.f32.mrf.mxu2 }
 0x3f7   : > { %v1868_v7 = vmax.f32 %v1822_v4, 0.0 }
 0x3f9   : > { %v1896_v49 = vmax.f32 %v1892_v54, %v1868_v7 }
 0x3fa   : > { %v1734_v51 = vpop.f32.mrf.mxu1 }
 0x3fb   : > { %v1735_v35 = vadd.f32 %v3043_v33, %v1734_v51 }
 0x3fd   : > { %v1838_v23 = vpop.f32.mrf.mxu2  ;;  %v1824_v48 = vadd.f32 %v1823_v52, %v1735_v35 }
 0x3ff   : > { %v1869_v54 = vmax.f32 %v1824_v48, 0.0 }
 0x401   : > { %v1897_v58 = vmax.f32 %v3089_v39, %v1869_v54 }
 0x402   : > { %v1737_v12 = vpop.f32.mrf.mxu1 }
 0x403   : > { %v1738_v3 = vadd.f32 %v3043_v33, %v1737_v12 }
 0x405   : > { %v1827_v21 = vadd.f32 %v1826_v5, %v1738_v3  ;;  %v1841_v40 = vpop.f32.mrf.mxu2 }
 0x407   : > { %v1870_v34 = vmax.f32 %v1827_v21, 0.0 }
 0x409   : > { %v1898_v30 = vmax.f32 %v1894_v36, %v1870_v34 }
 0x40a   : > { %v1739_v14 = vpop.f32.mrf.mxu1 }
 0x40b   : > { %v1740_v16 = vadd.f32 %v3043_v33, %v1739_v14 }
 0x40d   : > { %v1829_v22 = vadd.f32 %v1828_v9, %v1740_v16  ;;  %v1843_v57 = vpop.f32.mrf.mxu2 }
 0x40f   : > { %v1871_v29 = vmax.f32 %v1829_v22, 0.0 }
 0x411   : > { %v1899_v15 = vmax.f32 %v1895_v10, %v1871_v29 }
 0x412   : > { %v1742_v61 = vpop.f32.mrf.mxu1 }
 0x413   : > { %v1743_v42 = vadd.f32 %v3043_v33, %v1742_v61 }
 0x415   : > { %v1832_v46 = vadd.f32 %v1831_v18, %v1743_v42 }
 0x417   : > { %v1872_v53 = vmax.f32 %v1832_v46, 0.0 }
 0x419   : > { %v1900_v60 = vmax.f32 %v1896_v49, %v1872_v53 }
 0x41a   : > { %v1744_v17 = vpop.f32.mrf.mxu1 }
 0x41b   : > { %v1745_v43 = vadd.f32 %v3043_v33, %v1744_v17 }
 0x41d   : > { %v1834_v31 = vadd.f32 %v1833_v24, %v1745_v43 }
 0x41f   : > { %v1873_v55 = vmax.f32 %v1834_v31, 0.0 }
 0x421   : > { %v1901_v36 = vmax.f32 %v1897_v58, %v1873_v55 }
 0x422   : > { %v1747_v19 = vpop.f32.mrf.mxu1 }
 0x423   : > { %v1748_v13 = vadd.f32 %v3043_v33, %v1747_v19 }
 0x425   : > { %v1837_v25 = vadd.f32 %v1836_v20, %v1748_v13 }
 0x427   : > { %v1874_v11 = vmax.f32 %v1837_v25, 0.0 }
 0x429   : > { %v1902_v37 = vmax.f32 %v1898_v30, %v1874_v11 }
 0x42a   : > { %v1749_v26 = vpop.f32.mrf.mxu1 }
 0x42b   : > { %v1750_v28 = vadd.f32 %v3043_v33, %v1749_v26 }
 0x42d   : > { %v1839_v8 = vadd.f32 %v1838_v23, %v1750_v28 }
 0x42f   : > { %v1875_v32 = vmax.f32 %v1839_v8, 0.0 }
 0x431   : > { %v1903_v38 = vmax.f32 %v1899_v15, %v1875_v32 }
 0x432   : > { %v1752_v41 = vpop.f32.mrf.mxu1 }
 0x433   : > { %v1906_v44 = vmax.f32 %v1902_v37, %v1903_v38  ;;  %v1753_v27 = vadd.f32 %v3043_v33, %v1752_v41 }
 0x435   : > { %v1842_v47 = vadd.f32 %v1841_v40, %v1753_v27 }
 0x437   : > { %v1876_v59 = vmax.f32 %v1842_v47, 0.0 }
 0x439   : > { %v1904_v63 = vmax.f32 %v1900_v60, %v1876_v59 }
 0x43a   : > { %v1754_v50 = vpop.f32.mrf.mxu1 }
 0x43b   : > { %v1755_v6 = vadd.f32 %v3043_v33, %v1754_v50 }
 0x43d   : > { %v1844_v45 = vadd.f32 %v1843_v57, %v1755_v6 }
 0x43f   : > { %v1877_v0 = vmax.f32 %v1844_v45, 0.0 }
 0x441   : > { %v1905_v62 = vmax.f32 %v1901_v36, %v1877_v0  ;;  %1912 = sbr.rel (%p2284_p7) target bundleno = 1096 (0x448), region = 68 }
 0x443   : > { %v1907_v52 = vmax.f32 %v1904_v63, %v1905_v62 }
 0x445   : > { %v1908_v56 = vmax.f32 %v1906_v44, %v1907_v52 }
 0x447   : > { %1913 = vst [vmem:[%s2553_s12] sm:$0xff] %v1908_v56 }
 0x448 PF: > { %p2285_p8 = scmp.le.s32.totalorder %s2436_s17, 0 }
 0x44a   : > { %1917 = sbr.rel (%p2285_p8) target bundleno = 1107 (0x453), region = 72 }
 0x44f   : > { %v1918_v33 = vld [vmem:[%s2553_s12] sm:$0xff] }
 0x450   : > { %v1919_v39 = vmax.f32 %v1918_v33, %v1908_v56 }
 0x452   : > { %1920 = vst [vmem:[%s2553_s12] sm:$0xff] %v1919_v39 }
 0x453 PF: > { %s21_s21 = sadd.s32 1, %s2452_s21   ;;  %s3136_s17 = smov %s2444_s19 }
 0x454   : > { %p18_p9 = scmp.ge.s32.totalorder %s21_s21, 8   ;;  %s3137_s18 = smov %s2448_s20 }
 0x455   : > { %s3138_s19 = smov %s3141_s22  ;;  %s3139_s20 = smov %s3145_s23 }
 0x456   :  { %20 = sbr.rel (!%p18_p9) target bundleno = 3 (0x3), region = 102 }

</bundles_post_ra>
